<compile_context>
chip_gen: v7x
topology: tpu7x:2x2x1
jax: 0.10.0
libtpu: 0.0.40
codegen_flags: <defaults>
</compile_context>

<pallas_src>
import functools

import jax
import jax.numpy as jnp
from jax.experimental import pallas as pl
from jax.experimental.pallas import tpu as pltpu


def _conv3x3_relu(band, w_flat, bias, rows, W, c_out):
    """3x3 'same' conv + bias + ReLU on an already zero-padded band.

    band:   (rows + 2, W + 2, c_in) activations, halo included
    w_flat: (9 * c_in, c_out) weights, tap-major ordering (ky, kx, c_in)
    bias:   (1, c_out)
    returns (rows, W, c_out) float32
    """
    c_in = band.shape[-1]
    # Merge all 9 taps along the channel/lane axis -> one deep contraction
    # (K = 9*c_in) instead of 9 shallow K=c_in matmuls with per-tap reshapes.
    cols = jnp.concatenate(
        [band[ky:ky + rows, kx:kx + W, :] for ky in range(3) for kx in range(3)],
        axis=-1)                                       # (rows, W, 9*c_in)
    flat = cols.reshape(rows * W, 9 * c_in)            # single collapse per stage
    acc = jnp.dot(flat, w_flat, preferred_element_type=jnp.float32)
    acc = jnp.maximum(acc + bias, 0.0)                 # bias + ReLU in f32
    return acc.reshape(rows, W, c_out)


def _double_conv_kernel(x_ref, w1_ref, b1_ref, w2_ref, b2_ref, o_ref,
                        xpad_ref, mid_ref, *, H, W, TH, C_mid, C_out):
    r = pl.program_id(1)

    # Build the zero-padded image once per batch element; the input block and
    # this scratch stay resident in VMEM across all row tiles of this image.
    @pl.when(r == 0)
    def _():
        xpad_ref[...] = jnp.zeros_like(xpad_ref)
        xpad_ref[2:H + 2, 1:W + 1, :] = x_ref[0].astype(xpad_ref.dtype)

    t0 = pl.multiple_of(r * TH, TH)

    # ---- conv1 + ReLU for the TH + 2 intermediate rows this tile needs ----
    xband = xpad_ref[pl.ds(t0, TH + 4), :, :]          # (TH+4, W+2, Cin)
    h1 = _conv3x3_relu(xband, w1_ref[...], b1_ref[...], TH + 2, W, C_mid)

    # Intermediate activation stays in VMEM (never written to HBM), stored
    # with its 1-pixel zero halo in W; out-of-image halo rows are zeroed.
    mid_ref[...] = jnp.zeros_like(mid_ref)
    mid_ref[:, 1:W + 1, :] = h1.astype(mid_ref.dtype)

    @pl.when(r == 0)
    def _():
        mid_ref[0, :, :] = jnp.zeros((W + 2, C_mid), mid_ref.dtype)

    @pl.when(r == pl.num_programs(1) - 1)
    def _():
        mid_ref[TH + 1, :, :] = jnp.zeros((W + 2, C_mid), mid_ref.dtype)

    # ---- conv2 + ReLU for the TH output rows of this tile ----
    h2 = _conv3x3_relu(mid_ref[...], w2_ref[...], b2_ref[...], TH, W, C_out)
    o_ref[0] = h2.astype(o_ref.dtype)


def double_conv_nhwc(x, w1, b1, w2, b2, *, row_tile=8):
    """Fused DoubleConv, NHWC in/out. w*: (3,3,Cin,Cout) HWIO; b*: (Cout,)."""
    N, H, W, C_in = x.shape
    C_mid = w1.shape[-1]
    C_out = w2.shape[-1]

    # Row tile height: largest value <= row_tile dividing H (halo rows are
    # recomputed per tile, so tiles are independent).
    th = min(row_tile, H)
    while H % th:
        th -= 1
    num_row_tiles = H // th

    # Tap-major flattened weights: index = (ky*3 + kx)*Cin + c, matching the
    # concatenation order inside the kernel.  (Tiny; done once in XLA.)
    w1f = w1.reshape(9 * C_in, C_mid)
    w2f = w2.reshape(9 * C_mid, C_out)
    b1r = b1.reshape(1, C_mid)
    b2r = b2.reshape(1, C_out)

    kernel = functools.partial(_double_conv_kernel, H=H, W=W, TH=th,
                               C_mid=C_mid, C_out=C_out)

    # Size the scoped VMEM limit against the chosen tiles (with headroom).
    itemsize = jnp.dtype(x.dtype).itemsize
    est = 2 * (H * W * C_in + th * W * C_out) * itemsize               # dbl-buffered I/O blocks
    est += 2 * (w1f.size + w2f.size + b1r.size + b2r.size) * itemsize  # resident weights
    est += ((H + 4) * (W + 2) * C_in + (th + 2) * (W + 2) * C_mid) * itemsize  # scratch
    est += 2 * (th + 2) * W * 9 * max(C_in, C_mid) * 4                 # im2col temporaries
    vmem_limit = int(min(32 * 1024 * 1024, max(4 * 1024 * 1024, 2 * est)))

    return pl.pallas_call(
        kernel,
        out_shape=jax.ShapeDtypeStruct((N, H, W, C_out), x.dtype),
        grid_spec=pltpu.PrefetchScalarGridSpec(
            num_scalar_prefetch=0,
            grid=(N, num_row_tiles),
            in_specs=[
                # full image, resident in VMEM across the row-tile axis
                pl.BlockSpec((1, H, W, C_in), lambda n, r: (n, 0, 0, 0)),
                # weights / biases: full tensors, resident across the grid
                pl.BlockSpec((9 * C_in, C_mid), lambda n, r: (0, 0)),
                pl.BlockSpec((1, C_mid), lambda n, r: (0, 0)),
                pl.BlockSpec((9 * C_mid, C_out), lambda n, r: (0, 0)),
                pl.BlockSpec((1, C_out), lambda n, r: (0, 0)),
            ],
            out_specs=pl.BlockSpec((1, th, W, C_out), lambda n, r: (n, r, 0, 0)),
            scratch_shapes=[
                pltpu.VMEM((H + 4, W + 2, C_in), x.dtype),    # zero-padded input image
                pltpu.VMEM((th + 2, W + 2, C_mid), x.dtype),  # padded intermediate band
            ],
        ),
        compiler_params=pltpu.CompilerParams(
            # row-tile axis is "arbitrary": it carries the padded-image scratch
            dimension_semantics=("parallel", "arbitrary"),
            vmem_limit_bytes=vmem_limit,
        ),
    )(x, w1f, b1r, w2f, b2r)


def double_conv_nchw(x_nchw, w1, b1, w2, b2, *, row_tile=8):
    """PyTorch-equivalent forward: Conv2d(3x3,p=1)+ReLU twice, NCHW in/out.

    A single NCHW<->NHWC transpose pair wraps the fused kernel; in an
    NHWC-end-to-end model these transposes would be deleted entirely.
    """
    x_nhwc = jnp.transpose(x_nchw, (0, 2, 3, 1))
    y = double_conv_nhwc(x_nhwc, w1, b1, w2, b2, row_tile=row_tile)
    return jnp.transpose(y, (0, 3, 1, 2))


def init_params(key, in_channels, out_channels, dtype=jnp.float32):
    """Deterministic synthetic parameters (shapes match nn.Conv2d(Cin,Cout,3))."""
    k1, k2, k3, k4 = jax.random.split(key, 4)
    # Stored as (3, 3, Cin, Cout) = HWIO for the NHWC kernel.
    w1 = jax.random.normal(k1, (3, 3, in_channels, out_channels), dtype) * 0.1
    b1 = jax.random.normal(k2, (out_channels,), dtype) * 0.1
    w2 = jax.random.normal(k3, (3, 3, out_channels, out_channels), dtype) * 0.1
    b2 = jax.random.normal(k4, (out_channels,), dtype) * 0.1
    return w1, b1, w2, b2


if __name__ == "__main__":
    key = jax.random.PRNGKey(0)
    N, Cin, Cout, H, W = 2, 4, 8, 16, 16

    kx, kp = jax.random.split(key)
    x = jax.random.normal(kx, (N, Cin, H, W), jnp.float32)  # NCHW like PyTorch
    w1, b1, w2, b2 = init_params(kp, Cin, Cout)

    out = jax.jit(double_conv_nchw)(x, w1, b1, w2, b2)
    out = jax.block_until_ready(out)

    # Reference check with XLA conv (NCHW, OIHW) to validate semantics.
    def ref_conv(xn, w_hwio, b):
        w_oihw = jnp.transpose(w_hwio, (3, 2, 0, 1))
        y = jax.lax.conv_general_dilated(
            xn, w_oihw, window_strides=(1, 1), padding="SAME",
            dimension_numbers=("NCHW", "OIHW", "NCHW"))
        return jnp.maximum(y + b[None, :, None, None], 0.0)

    ref = ref_conv(ref_conv(x, w1, b1), w2, b2)
    assert out.shape == (N, Cout, H, W)
    assert jnp.allclose(out, ref, atol=1e-4, rtol=1e-4)

    print("KERNEL_OK")
</pallas_src>

<mosaic_0001>
module attributes {stable_mosaic.version = 11 : i64} {
  func.func @_double_conv_kernel(%arg0: i32, %arg1: i32, %arg2: memref<1x16x16x4xf32, #tpu.memory_space<vmem>>, %arg3: memref<36x8xf32, #tpu.memory_space<vmem>>, %arg4: memref<1x8xf32, #tpu.memory_space<vmem>>, %arg5: memref<72x8xf32, #tpu.memory_space<vmem>>, %arg6: memref<1x8xf32, #tpu.memory_space<vmem>>, %arg7: memref<1x8x16x8xf32, #tpu.memory_space<vmem>>, %arg8: memref<20x18x4xf32, #tpu.memory_space<vmem>>, %arg9: memref<10x18x8xf32, #tpu.memory_space<vmem>>) attributes {dimension_semantics = [#tpu.dimension_semantics<parallel>, #tpu.dimension_semantics<arbitrary>], iteration_bounds = array<i64: 2, 2>, scalar_prefetch = 0 : i64, scratch_operands = 2 : i64, tpu.core_type = #tpu.core_type<tc>, window_params = [{transform_indices = @transform_0, window_bounds = array<i64: 1, 16, 16, 4>}, {pipeline_mode = #tpu.pipeline_mode<synchronous>, transform_indices = @transform_1, window_bounds = array<i64: 36, 8>}, {pipeline_mode = #tpu.pipeline_mode<synchronous>, transform_indices = @transform_2, window_bounds = array<i64: 1, 8>}, {pipeline_mode = #tpu.pipeline_mode<synchronous>, transform_indices = @transform_3, window_bounds = array<i64: 72, 8>}, {pipeline_mode = #tpu.pipeline_mode<synchronous>, transform_indices = @transform_4, window_bounds = array<i64: 1, 8>}, {transform_indices = @transform_5, window_bounds = array<i64: 1, 8, 16, 8>}]} {
    %c0_i32 = arith.constant 0 : i32
    %0 = arith.cmpi eq, %arg1, %c0_i32 : i32
    %1 = arith.extui %0 : i1 to i32
    %c0_i32_0 = arith.constant 0 : i32
    %2 = arith.cmpi ne, %1, %c0_i32_0 : i32
    scf.if %2 {
      %cst_29 = arith.constant 0.000000e+00 : f32
      %58 = vector.broadcast %cst_29 : f32 to vector<20x18x4xf32>
      %c0_30 = arith.constant 0 : index
      %c0_31 = arith.constant 0 : index
      %c0_32 = arith.constant 0 : index
      %59 = vector.load %arg8[%c0_30, %c0_31, %c0_32] : memref<20x18x4xf32, #tpu.memory_space<vmem>>, vector<20x18x4xf32>
      tpu.vector_store %arg8[%c0_30, %c0_31, %c0_32], %58 {strides = array<i32>} : memref<20x18x4xf32, #tpu.memory_space<vmem>>, vector<20x18x4xf32>,
      %c0_33 = arith.constant 0 : index
      %c0_34 = arith.constant 0 : index
      %c0_35 = arith.constant 0 : index
      %c0_36 = arith.constant 0 : index
      %60 = vector.load %arg2[%c0_33, %c0_34, %c0_35, %c0_36] : memref<1x16x16x4xf32, #tpu.memory_space<vmem>>, vector<1x16x16x4xf32>
      %61 = vector.shape_cast %60 : vector<1x16x16x4xf32> to vector<16x16x4xf32>
      %c2 = arith.constant 2 : index
      %c1_37 = arith.constant 1 : index
      %c0_38 = arith.constant 0 : index
      %62 = vector.load %arg8[%c2, %c1_37, %c0_38] : memref<20x18x4xf32, #tpu.memory_space<vmem>>, vector<16x16x4xf32>
      tpu.vector_store %arg8[%c2, %c1_37, %c0_38], %61 {strides = array<i32>} : memref<20x18x4xf32, #tpu.memory_space<vmem>>, vector<16x16x4xf32>,
    } else {
    }
    %c8_i32 = arith.constant 8 : i32
    %3 = arith.muli %arg1, %c8_i32 : i32
    %4 = tpu.assume_multiple %3, 8 : i32
    %5 = arith.index_cast %4 : i32 to index
    %c0 = arith.constant 0 : index
    %c0_1 = arith.constant 0 : index
    %6 = vector.load %arg8[%5, %c0, %c0_1] : memref<20x18x4xf32, #tpu.memory_space<vmem>>, vector<12x18x4xf32>
    %c0_2 = arith.constant 0 : index
    %c0_3 = arith.constant 0 : index
    %7 = vector.load %arg3[%c0_2, %c0_3] : memref<36x8xf32, #tpu.memory_space<vmem>>, vector<36x8xf32>
    %c0_4 = arith.constant 0 : index
    %c0_5 = arith.constant 0 : index
    %8 = vector.load %arg4[%c0_4, %c0_5] : memref<1x8xf32, #tpu.memory_space<vmem>>, vector<1x8xf32>
    %9 = vector.extract_strided_slice %6 {offsets = [0, 0, 0], sizes = [10, 16, 4], strides = [1, 1, 1]} : vector<12x18x4xf32> to vector<10x16x4xf32>
    %10 = vector.extract_strided_slice %6 {offsets = [0, 1, 0], sizes = [10, 16, 4], strides = [1, 1, 1]} : vector<12x18x4xf32> to vector<10x16x4xf32>
    %11 = vector.extract_strided_slice %6 {offsets = [0, 2, 0], sizes = [10, 16, 4], strides = [1, 1, 1]} : vector<12x18x4xf32> to vector<10x16x4xf32>
    %12 = vector.extract_strided_slice %6 {offsets = [1, 0, 0], sizes = [10, 16, 4], strides = [1, 1, 1]} : vector<12x18x4xf32> to vector<10x16x4xf32>
    %13 = vector.extract_strided_slice %6 {offsets = [1, 1, 0], sizes = [10, 16, 4], strides = [1, 1, 1]} : vector<12x18x4xf32> to vector<10x16x4xf32>
    %14 = vector.extract_strided_slice %6 {offsets = [1, 2, 0], sizes = [10, 16, 4], strides = [1, 1, 1]} : vector<12x18x4xf32> to vector<10x16x4xf32>
    %15 = vector.extract_strided_slice %6 {offsets = [2, 0, 0], sizes = [10, 16, 4], strides = [1, 1, 1]} : vector<12x18x4xf32> to vector<10x16x4xf32>
    %16 = vector.extract_strided_slice %6 {offsets = [2, 1, 0], sizes = [10, 16, 4], strides = [1, 1, 1]} : vector<12x18x4xf32> to vector<10x16x4xf32>
    %17 = vector.extract_strided_slice %6 {offsets = [2, 2, 0], sizes = [10, 16, 4], strides = [1, 1, 1]} : vector<12x18x4xf32> to vector<10x16x4xf32>
    %18 = tpu.concatenate %9, %10, %11, %12, %13, %14, %15, %16, %17 in 2 : vector<10x16x4xf32>, vector<10x16x4xf32>, vector<10x16x4xf32>, vector<10x16x4xf32>, vector<10x16x4xf32>, vector<10x16x4xf32>, vector<10x16x4xf32>, vector<10x16x4xf32>, vector<10x16x4xf32> -> vector<10x16x36xf32>
    %19 = vector.shape_cast %18 : vector<10x16x36xf32> to vector<160x36xf32>
    %cst = arith.constant dense<0.000000e+00> : vector<160x8xf32>
    %20 = tpu.matmul %19, %7, %cst {dimension_numbers = #tpu.dot_dimension_numbers<[1], [0], [0], [1], [0, 0, 1, 1], [], []>} : vector<160x36xf32>, vector<36x8xf32>, vector<160x8xf32> -> vector<160x8xf32>
    %21 = vector.broadcast %8 : vector<1x8xf32> to vector<160x8xf32>
    %22 = arith.addf %20, %21 : vector<160x8xf32>
    %cst_6 = arith.constant 0.000000e+00 : f32
    %23 = vector.broadcast %cst_6 : f32 to vector<160x8xf32>
    %24 = arith.maximumf %22, %23 : vector<160x8xf32>
    %25 = vector.shape_cast %24 : vector<160x8xf32> to vector<10x16x8xf32>
    %cst_7 = arith.constant 0.000000e+00 : f32
    %26 = vector.broadcast %cst_7 : f32 to vector<10x18x8xf32>
    %c0_8 = arith.constant 0 : index
    %c0_9 = arith.constant 0 : index
    %c0_10 = arith.constant 0 : index
    %27 = vector.load %arg9[%c0_8, %c0_9, %c0_10] : memref<10x18x8xf32, #tpu.memory_space<vmem>>, vector<10x18x8xf32>
    tpu.vector_store %arg9[%c0_8, %c0_9, %c0_10], %26 {strides = array<i32>} : memref<10x18x8xf32, #tpu.memory_space<vmem>>, vector<10x18x8xf32>,
    %c0_11 = arith.constant 0 : index
    %c1 = arith.constant 1 : index
    %c0_12 = arith.constant 0 : index
    %28 = vector.load %arg9[%c0_11, %c1, %c0_12] : memref<10x18x8xf32, #tpu.memory_space<vmem>>, vector<10x16x8xf32>
    tpu.vector_store %arg9[%c0_11, %c1, %c0_12], %25 {strides = array<i32>} : memref<10x18x8xf32, #tpu.memory_space<vmem>>, vector<10x16x8xf32>,
    %c0_i32_13 = arith.constant 0 : i32
    %29 = arith.cmpi eq, %arg1, %c0_i32_13 : i32
    %30 = arith.extui %29 : i1 to i32
    %c0_i32_14 = arith.constant 0 : i32
    %31 = arith.cmpi ne, %30, %c0_i32_14 : i32
    scf.if %31 {
      %cst_29 = arith.constant 0.000000e+00 : f32
      %58 = vector.broadcast %cst_29 : f32 to vector<18x8xf32>
      %c0_30 = arith.constant 0 : index
      %c0_31 = arith.constant 0 : index
      %c0_32 = arith.constant 0 : index
      %59 = vector.load %arg9[%c0_30, %c0_31, %c0_32] : memref<10x18x8xf32, #tpu.memory_space<vmem>>, vector<1x18x8xf32>
      %60 = vector.shape_cast %59 : vector<1x18x8xf32> to vector<18x8xf32>
      %61 = vector.shape_cast %58 : vector<18x8xf32> to vector<1x18x8xf32>
      tpu.vector_store %arg9[%c0_30, %c0_31, %c0_32], %61 {strides = array<i32>} : memref<10x18x8xf32, #tpu.memory_space<vmem>>, vector<1x18x8xf32>,
    } else {
    }
    %c1_i32 = arith.constant 1 : i32
    %32 = arith.cmpi eq, %arg1, %c1_i32 : i32
    %33 = arith.extui %32 : i1 to i32
    %c0_i32_15 = arith.constant 0 : i32
    %34 = arith.cmpi ne, %33, %c0_i32_15 : i32
    scf.if %34 {
      %cst_29 = arith.constant 0.000000e+00 : f32
      %58 = vector.broadcast %cst_29 : f32 to vector<18x8xf32>
      %c9 = arith.constant 9 : index
      %c0_30 = arith.constant 0 : index
      %c0_31 = arith.constant 0 : index
      %59 = vector.load %arg9[%c9, %c0_30, %c0_31] : memref<10x18x8xf32, #tpu.memory_space<vmem>>, vector<1x18x8xf32>
      %60 = vector.shape_cast %59 : vector<1x18x8xf32> to vector<18x8xf32>
      %61 = vector.shape_cast %58 : vector<18x8xf32> to vector<1x18x8xf32>
      tpu.vector_store %arg9[%c9, %c0_30, %c0_31], %61 {strides = array<i32>} : memref<10x18x8xf32, #tpu.memory_space<vmem>>, vector<1x18x8xf32>,
    } else {
    }
    %c0_16 = arith.constant 0 : index
    %c0_17 = arith.constant 0 : index
    %c0_18 = arith.constant 0 : index
    %35 = vector.load %arg9[%c0_16, %c0_17, %c0_18] : memref<10x18x8xf32, #tpu.memory_space<vmem>>, vector<10x18x8xf32>
    %c0_19 = arith.constant 0 : index
    %c0_20 = arith.constant 0 : index
    %36 = vector.load %arg5[%c0_19, %c0_20] : memref<72x8xf32, #tpu.memory_space<vmem>>, vector<72x8xf32>
    %c0_21 = arith.constant 0 : index
    %c0_22 = arith.constant 0 : index
    %37 = vector.load %arg6[%c0_21, %c0_22] : memref<1x8xf32, #tpu.memory_space<vmem>>, vector<1x8xf32>
    %38 = vector.extract_strided_slice %35 {offsets = [0, 0, 0], sizes = [8, 16, 8], strides = [1, 1, 1]} : vector<10x18x8xf32> to vector<8x16x8xf32>
    %39 = vector.extract_strided_slice %35 {offsets = [0, 1, 0], sizes = [8, 16, 8], strides = [1, 1, 1]} : vector<10x18x8xf32> to vector<8x16x8xf32>
    %40 = vector.extract_strided_slice %35 {offsets = [0, 2, 0], sizes = [8, 16, 8], strides = [1, 1, 1]} : vector<10x18x8xf32> to vector<8x16x8xf32>
    %41 = vector.extract_strided_slice %35 {offsets = [1, 0, 0], sizes = [8, 16, 8], strides = [1, 1, 1]} : vector<10x18x8xf32> to vector<8x16x8xf32>
    %42 = vector.extract_strided_slice %35 {offsets = [1, 1, 0], sizes = [8, 16, 8], strides = [1, 1, 1]} : vector<10x18x8xf32> to vector<8x16x8xf32>
    %43 = vector.extract_strided_slice %35 {offsets = [1, 2, 0], sizes = [8, 16, 8], strides = [1, 1, 1]} : vector<10x18x8xf32> to vector<8x16x8xf32>
    %44 = vector.extract_strided_slice %35 {offsets = [2, 0, 0], sizes = [8, 16, 8], strides = [1, 1, 1]} : vector<10x18x8xf32> to vector<8x16x8xf32>
    %45 = vector.extract_strided_slice %35 {offsets = [2, 1, 0], sizes = [8, 16, 8], strides = [1, 1, 1]} : vector<10x18x8xf32> to vector<8x16x8xf32>
    %46 = vector.extract_strided_slice %35 {offsets = [2, 2, 0], sizes = [8, 16, 8], strides = [1, 1, 1]} : vector<10x18x8xf32> to vector<8x16x8xf32>
    %47 = tpu.concatenate %38, %39, %40, %41, %42, %43, %44, %45, %46 in 2 : vector<8x16x8xf32>, vector<8x16x8xf32>, vector<8x16x8xf32>, vector<8x16x8xf32>, vector<8x16x8xf32>, vector<8x16x8xf32>, vector<8x16x8xf32>, vector<8x16x8xf32>, vector<8x16x8xf32> -> vector<8x16x72xf32>
    %48 = vector.shape_cast %47 : vector<8x16x72xf32> to vector<128x72xf32>
    %cst_23 = arith.constant dense<0.000000e+00> : vector<128x8xf32>
    %49 = tpu.matmul %48, %36, %cst_23 {dimension_numbers = #tpu.dot_dimension_numbers<[1], [0], [0], [1], [0, 0, 1, 1], [], []>} : vector<128x72xf32>, vector<72x8xf32>, vector<128x8xf32> -> vector<128x8xf32>
    %50 = vector.broadcast %37 : vector<1x8xf32> to vector<128x8xf32>
    %51 = arith.addf %49, %50 : vector<128x8xf32>
    %cst_24 = arith.constant 0.000000e+00 : f32
    %52 = vector.broadcast %cst_24 : f32 to vector<128x8xf32>
    %53 = arith.maximumf %51, %52 : vector<128x8xf32>
    %54 = vector.shape_cast %53 : vector<128x8xf32> to vector<8x16x8xf32>
    %c0_25 = arith.constant 0 : index
    %c0_26 = arith.constant 0 : index
    %c0_27 = arith.constant 0 : index
    %c0_28 = arith.constant 0 : index
    %55 = vector.load %arg7[%c0_25, %c0_26, %c0_27, %c0_28] : memref<1x8x16x8xf32, #tpu.memory_space<vmem>>, vector<1x8x16x8xf32>
    %56 = vector.shape_cast %55 : vector<1x8x16x8xf32> to vector<8x16x8xf32>
    %57 = vector.shape_cast %54 : vector<8x16x8xf32> to vector<1x8x16x8xf32>
    tpu.vector_store %arg7[%c0_25, %c0_26, %c0_27, %c0_28], %57 {strides = array<i32>} : memref<1x8x16x8xf32, #tpu.memory_space<vmem>>, vector<1x8x16x8xf32>,
    return
  }
  func.func @transform_0(%arg0: i32, %arg1: i32) -> (i32, i32, i32, i32) {
    %c0_i32 = arith.constant 0 : i32
    %c0_i32_0 = arith.constant 0 : i32
    %c0_i32_1 = arith.constant 0 : i32
    %c0_i32_2 = arith.constant 0 : i32
    return %arg0, %c0_i32, %c0_i32_0, %c0_i32_1 : i32, i32, i32, i32
  }
  func.func @transform_1(%arg0: i32, %arg1: i32) -> (i32, i32) {
    %c0_i32 = arith.constant 0 : i32
    %c0_i32_0 = arith.constant 0 : i32
    %c0_i32_1 = arith.constant 0 : i32
    return %c0_i32, %c0_i32_0 : i32, i32
  }
  func.func @transform_2(%arg0: i32, %arg1: i32) -> (i32, i32) {
    %c0_i32 = arith.constant 0 : i32
    %c0_i32_0 = arith.constant 0 : i32
    %c0_i32_1 = arith.constant 0 : i32
    return %c0_i32, %c0_i32_0 : i32, i32
  }
  func.func @transform_3(%arg0: i32, %arg1: i32) -> (i32, i32) {
    %c0_i32 = arith.constant 0 : i32
    %c0_i32_0 = arith.constant 0 : i32
    %c0_i32_1 = arith.constant 0 : i32
    return %c0_i32, %c0_i32_0 : i32, i32
  }
  func.func @transform_4(%arg0: i32, %arg1: i32) -> (i32, i32) {
    %c0_i32 = arith.constant 0 : i32
    %c0_i32_0 = arith.constant 0 : i32
    %c0_i32_1 = arith.constant 0 : i32
    return %c0_i32, %c0_i32_0 : i32, i32
  }
  func.func @transform_5(%arg0: i32, %arg1: i32) -> (i32, i32, i32, i32) {
    %c0_i32 = arith.constant 0 : i32
    %c0_i32_0 = arith.constant 0 : i32
    %c0_i32_1 = arith.constant 0 : i32
    return %arg0, %arg1, %c0_i32, %c0_i32_0 : i32, i32, i32, i32
  }
}

</mosaic_0001>

<bundles_post_ra>
// kernel: double_conv_nchw.1
= control target key start
LH: loop header
LB: loop body
LE: loop exit
PB: predicated region body
PF: predicated region fallthrough
CT: control target
= control target key end

     0   :  { %s2919_s18 = smov 0   ;;  %s2921_s19 = smov 0   ;;  %s4500_s0 = inlined_call_operand.vmem [shape: f32[2,16,16,4], index: 0, kind: input, shape index: {}]   ;;  %s4501_s1 = inlined_call_operand.vmem [shape: f32[36,8], index: 1, kind: input, shape index: {}]   ;;  %s4502_s2 = inlined_call_operand.vmem [shape: f32[1,8], index: 2, kind: input, shape index: {}]   ;;  %s4503_s3 = inlined_call_operand.vmem [shape: f32[72,8], index: 3, kind: input, shape index: {}]   ;;  %s4504_s4 = inlined_call_operand.vmem [shape: f32[1,8], index: 4, kind: input, shape index: {}]   ;;  %s4505_s5 = inlined_call_operand.vmem [shape: f32[2,16,16,8], index: 5, kind: output, shape index: {}]  }
   0x1   :  { %s2923_s20 = smov 0   ;;  %s2925_s21 = smov 0  }
   0x2   :  { %s2927_s22 = smov 0  }
   0x3 LB: > { %s24_s23 = sadd.s32 1, %s2863_s20  ;;  %s27_s24 = sadd.s32 1, %s2867_s21  ;;  %s2871_s22 = sphi %s2927_s22, %s15_s22   ;;  %s2867_s21 = sphi %s2925_s21, %s4509_s21   ;;  %s2863_s20 = sphi %s2923_s20, %s4508_s20   ;;  %s2859_s19 = sphi %s2921_s19, %s4507_s19   ;;  %s2855_s18 = sphi %s2919_s18, %s4506_s18  }
   0x4   : > { %p25_p0 = scmp.ge.s32.totalorder %s24_s23, 2  ;;  %p2567_p1 = scmp.ge.s32.totalorder %s2871_s22, 1 }
   0x5   : > { %p201_p2 = scmp.lt.s32.totalorder %s2871_s22, 5 }
   0x6   : > { %s4511_s23 = smov (%p25_p0, %s24_s23), 0  ;;  %s4513_s24 = smov (!%p25_p0, %s27_s24), %s2867_s21 }
   0x7   : > { %p202_p3 = pnand %p2567_p1, %p201_p2  ;;  %p29_p4 = scmp.ge.s32.totalorder %s4513_s24, 2 }
   0x8   : > { %p234_p5 = scmp.lt.s32.totalorder (!%p202_p3), %s2859_s19, 1  ;;  %s2570_s25 = sshll.u32 (!%p202_p3), %s2855_s18, 3 }
   0x9   : > { %s4515_s24 = smov (%p29_p4, %s4513_s24), 0  ;;  %205 = sbr.rel (%p202_p3) target bundleno = 1326 (0x52e), region = 40 }
   0xa   : > { %p242_p6 = scmp.lt.s32.totalorder (!%p202_p3), %s2570_s25, 15  ;;  %p2574_p7 = scmp.ne.s32.totalorder (!%p202_p3), %s2855_s18, 0 }
  0x10   : > { %s4517_s19 = smov (!%p234_p5, %s2859_s19), 1  ;;  %s4519_s25 = smov (!%p242_p6, %s2570_s25), 15 }
  0x11   : > { %s2620_s26 = sshll.u32 %s4517_s19, 8  ;;  %s2572_s27 = sshll.u32 %s4517_s19, 5  ;;  %vm254_vm0 = vcmask (!%p2574_p7), 31744   ;;  %vm257_vm1 = vcmask (!%p2574_p7), 25600   ;;  %v2873_v3 = vmov (!%p2574_p7), 0.0  }
  0x12   : > { %s2955_s30 = scalar_lea.vmem %s4500_s0, %s2620_s26  ;;  %s2571_s6 = sshll.u32 %s4519_s25, 1  ;;  %262 = vst.msk [vmem:[#allocation2 + $0x30] sm:$0xff] (!%p2574_p7), %vm254_vm0, %v2873_v3  ;;  %255 = vst.msk [vmem:[#allocation2] sm:$0xff] (!%p2574_p7), %vm254_vm0, %v2873_v3 }
  0x13   : > { %s246_s7 = sadd.s32 %s2572_s27, %s2571_s6  ;;  %253 = sbr.rel (%p2574_p7) target bundleno = 65 (0x41), region = 44  ;;  %v2966_v0 = vld [vmem:[%s2955_s30] sm:$0xff] (!%p2574_p7)  ;;  %v2969_v1 = vld [vmem:[%s2955_s30 + $0x8] sm:$0xff] (!%p2574_p7)  ;;  %v2972_v2 = vld [vmem:[%s2955_s30 + $0x10] sm:$0xff] (!%p2574_p7)  ;;  %256 = vst.msk [vmem:[#allocation2 + $0x8] sm:$0xff] (!%p2574_p7), %vm254_vm0, %v2873_v3 }
  0x14   : > { %s2573_s8 = sshll.u32 %s246_s7, 3  ;;  %259 = vst.msk [vmem:[#allocation2 + $0x18] sm:$0xff] (!%p2574_p7), %vm254_vm0, %v2873_v3  ;;  %260 = vst.msk [vmem:[#allocation2 + $0x20] sm:$0xff] (!%p2574_p7), %vm254_vm0, %v2873_v3  ;;  %v319_v4 = vld [vmem:[%s2955_s30 + $0x18] sm:$0xff] (!%p2574_p7)  ;;  %v320_v5 = vld [vmem:[%s2955_s30 + $0x20] sm:$0xff] (!%p2574_p7) }
  0x15   : > { %s2960_s11 = scalar_lea.vmem %s4505_s5, %s2573_s8  ;;  %263 = vst.msk [vmem:[#allocation2 + $0x38] sm:$0xff] (!%p2574_p7), %vm254_vm0, %v2873_v3  ;;  %265 = vst.msk [vmem:[#allocation2 + $0x48] sm:$0xff] (!%p2574_p7), %vm254_vm0, %v2873_v3  ;;  %v321_v6 = vld [vmem:[%s2955_s30 + $0x28] sm:$0xff] (!%p2574_p7)  ;;  %v322_v7 = vld [vmem:[%s2955_s30 + $0x30] sm:$0xff] (!%p2574_p7) }
  0x16   : > { %266 = vst.msk [vmem:[#allocation2 + $0x50] sm:$0xff] (!%p2574_p7), %vm254_vm0, %v2873_v3  ;;  %268 = vst.msk [vmem:[#allocation2 + $0x60] sm:$0xff] (!%p2574_p7), %vm254_vm0, %v2873_v3  ;;  %v323_v8 = vld [vmem:[%s2955_s30 + $0x38] sm:$0xff] (!%p2574_p7)  ;;  %v324_v9 = vld [vmem:[%s2955_s30 + $0x40] sm:$0xff] (!%p2574_p7) }
  0x17   : > { %269 = vst.msk [vmem:[#allocation2 + $0x68] sm:$0xff] (!%p2574_p7), %vm254_vm0, %v2873_v3  ;;  %271 = vst.msk [vmem:[#allocation2 + $0x78] sm:$0xff] (!%p2574_p7), %vm254_vm0, %v2873_v3  ;;  %v325_v10 = vld [vmem:[%s2955_s30 + $0x48] sm:$0xff] (!%p2574_p7)  ;;  %v326_v11 = vld [vmem:[%s2955_s30 + $0x50] sm:$0xff] (!%p2574_p7) }
  0x18   : > { %272 = vst.msk [vmem:[#allocation2 + $0x80] sm:$0xff] (!%p2574_p7), %vm254_vm0, %v2873_v3  ;;  %274 = vst.msk [vmem:[#allocation2 + $0x90] sm:$0xff] (!%p2574_p7), %vm254_vm0, %v2873_v3  ;;  %v327_v12 = vld [vmem:[%s2955_s30 + $0x58] sm:$0xff] (!%p2574_p7)  ;;  %v328_v13 = vld [vmem:[%s2955_s30 + $0x60] sm:$0xff] (!%p2574_p7) }
  0x19   : > { %275 = vst.msk [vmem:[#allocation2 + $0x98] sm:$0xff] (!%p2574_p7), %vm254_vm0, %v2873_v3  ;;  %277 = vst.msk [vmem:[#allocation2 + $0xa8] sm:$0xff] (!%p2574_p7), %vm254_vm0, %v2873_v3  ;;  %v329_v14 = vld [vmem:[%s2955_s30 + $0x68] sm:$0xff] (!%p2574_p7)  ;;  %v330_v15 = vld [vmem:[%s2955_s30 + $0x70] sm:$0xff] (!%p2574_p7) }
  0x1a   : > { %278 = vst.msk [vmem:[#allocation2 + $0xb0] sm:$0xff] %vm254_vm0, %v2873_v3  ;;  %280 = vst.msk [vmem:[#allocation2 + $0xc0] sm:$0xff] %vm254_vm0, %v2873_v3  ;;  %v331_v16 = vld [vmem:[%s2955_s30 + $0x78] sm:$0xff]  ;;  %v332_v17 = vld [vmem:[%s2955_s30 + $0x80] sm:$0xff] }
  0x1b   : > { %281 = vst.msk [vmem:[#allocation2 + $0xc8] sm:$0xff] %vm254_vm0, %v2873_v3  ;;  %283 = vst.msk [vmem:[#allocation2 + $0xd8] sm:$0xff] %vm254_vm0, %v2873_v3  ;;  %v333_v18 = vld [vmem:[%s2955_s30 + $0x88] sm:$0xff]  ;;  %v334_v19 = vld [vmem:[%s2955_s30 + $0x90] sm:$0xff] }
  0x1c   : > { %284 = vst.msk [vmem:[#allocation2 + $0xe0] sm:$0xff] %vm254_vm0, %v2873_v3  ;;  %286 = vst.msk [vmem:[#allocation2 + $0xf0] sm:$0xff] %vm254_vm0, %v2873_v3  ;;  %v335_v20 = vld [vmem:[%s2955_s30 + $0x98] sm:$0xff]  ;;  %v336_v21 = vld [vmem:[%s2955_s30 + $0xa0] sm:$0xff] }
  0x1d   : > { %287 = vst.msk [vmem:[#allocation2 + $0xf8] sm:$0xff] %vm254_vm0, %v2873_v3  ;;  %289 = vst.msk [vmem:[#allocation2 + $0x108] sm:$0xff] %vm254_vm0, %v2873_v3  ;;  %v337_v22 = vld [vmem:[%s2955_s30 + $0xa8] sm:$0xff]  ;;  %v338_v23 = vld [vmem:[%s2955_s30 + $0xb0] sm:$0xff] }
  0x1e   : > { %290 = vst.msk [vmem:[#allocation2 + $0x110] sm:$0xff] %vm254_vm0, %v2873_v3  ;;  %292 = vst.msk [vmem:[#allocation2 + $0x120] sm:$0xff] %vm254_vm0, %v2873_v3  ;;  %v339_v24 = vld [vmem:[%s2955_s30 + $0xb8] sm:$0xff]  ;;  %v340_v25 = vld [vmem:[%s2955_s30 + $0xc0] sm:$0xff] }
  0x1f   : > { %293 = vst.msk [vmem:[#allocation2 + $0x128] sm:$0xff] %vm254_vm0, %v2873_v3  ;;  %295 = vst.msk [vmem:[#allocation2 + $0x138] sm:$0xff] %vm254_vm0, %v2873_v3  ;;  %v341_v26 = vld [vmem:[%s2955_s30 + $0xc8] sm:$0xff]  ;;  %v342_v27 = vld [vmem:[%s2955_s30 + $0xd0] sm:$0xff] }
  0x20   : > { %296 = vst.msk [vmem:[#allocation2 + $0x140] sm:$0xff] %vm254_vm0, %v2873_v3  ;;  %298 = vst.msk [vmem:[#allocation2 + $0x150] sm:$0xff] %vm254_vm0, %v2873_v3  ;;  %v343_v28 = vld [vmem:[%s2955_s30 + $0xd8] sm:$0xff]  ;;  %v344_v29 = vld [vmem:[%s2955_s30 + $0xe0] sm:$0xff] }
  0x21   : > { %299 = vst.msk [vmem:[#allocation2 + $0x158] sm:$0xff] %vm254_vm0, %v2873_v3  ;;  %301 = vst.msk [vmem:[#allocation2 + $0x168] sm:$0xff] %vm254_vm0, %v2873_v3  ;;  %v345_v30 = vld [vmem:[%s2955_s30 + $0xe8] sm:$0xff]  ;;  %v346_v31 = vld [vmem:[%s2955_s30 + $0xf0] sm:$0xff] }
  0x22   : > { %302 = vst.msk [vmem:[#allocation2 + $0x170] sm:$0xff] %vm254_vm0, %v2873_v3  ;;  %304 = vst.msk [vmem:[#allocation2 + $0x180] sm:$0xff] %vm254_vm0, %v2873_v3  ;;  %v347_v32 = vld [vmem:[%s2955_s30 + $0xf8] sm:$0xff] }
  0x23   : > { %305 = vst.msk [vmem:[#allocation2 + $0x188] sm:$0xff] %vm254_vm0, %v2873_v3  ;;  %307 = vst.msk [vmem:[#allocation2 + $0x198] sm:$0xff] %vm254_vm0, %v2873_v3 }
  0x24   : > { %308 = vst.msk [vmem:[#allocation2 + $0x1a0] sm:$0xff] %vm254_vm0, %v2873_v3  ;;  %310 = vst.msk [vmem:[#allocation2 + $0x1b0] sm:$0xff] %vm254_vm0, %v2873_v3 }
  0x25   : > { %311 = vst.msk [vmem:[#allocation2 + $0x1b8] sm:$0xff] %vm254_vm0, %v2873_v3  ;;  %313 = vst.msk [vmem:[#allocation2 + $0x1c8] sm:$0xff] %vm254_vm0, %v2873_v3 }
  0x26   : > { %314 = vst.msk [vmem:[#allocation2 + $0x1d0] sm:$0xff] %vm254_vm0, %v2873_v3  ;;  %349 = vst.msk [vmem:[#allocation2 + $0x31] sm:$0xff] %vm254_vm0, %v2966_v0 }
  0x27   : > { %264 = vst.msk [vmem:[#allocation2 + $0x40] sm:$0x3] %vm257_vm1, %v2873_v3  ;;  %258 = vst.msk [vmem:[#allocation2 + $0x10] sm:$0x3] %vm257_vm1, %v2873_v3 }
  0x28   : > { %261 = vst.msk [vmem:[#allocation2 + $0x28] sm:$0x3] %vm257_vm1, %v2873_v3  ;;  %267 = vst.msk [vmem:[#allocation2 + $0x58] sm:$0x3] %vm257_vm1, %v2873_v3 }
  0x29   : > { %270 = vst.msk [vmem:[#allocation2 + $0x70] sm:$0x3] %vm257_vm1, %v2873_v3  ;;  %273 = vst.msk [vmem:[#allocation2 + $0x88] sm:$0x3] %vm257_vm1, %v2873_v3 }
  0x2a   : > { %276 = vst.msk [vmem:[#allocation2 + $0xa0] sm:$0x3] %vm257_vm1, %v2873_v3  ;;  %279 = vst.msk [vmem:[#allocation2 + $0xb8] sm:$0x3] %vm257_vm1, %v2873_v3 }
  0x2b   : > { %282 = vst.msk [vmem:[#allocation2 + $0xd0] sm:$0x3] %vm257_vm1, %v2873_v3  ;;  %285 = vst.msk [vmem:[#allocation2 + $0xe8] sm:$0x3] %vm257_vm1, %v2873_v3 }
  0x2c   : > { %288 = vst.msk [vmem:[#allocation2 + $0x100] sm:$0x3] %vm257_vm1, %v2873_v3  ;;  %291 = vst.msk [vmem:[#allocation2 + $0x118] sm:$0x3] %vm257_vm1, %v2873_v3 }
  0x2d   : > { %294 = vst.msk [vmem:[#allocation2 + $0x130] sm:$0x3] %vm257_vm1, %v2873_v3  ;;  %297 = vst.msk [vmem:[#allocation2 + $0x148] sm:$0x3] %vm257_vm1, %v2873_v3 }
  0x2e   : > { %300 = vst.msk [vmem:[#allocation2 + $0x160] sm:$0x3] %vm257_vm1, %v2873_v3  ;;  %303 = vst.msk [vmem:[#allocation2 + $0x178] sm:$0x3] %vm257_vm1, %v2873_v3 }
  0x2f   : > { %306 = vst.msk [vmem:[#allocation2 + $0x190] sm:$0x3] %vm257_vm1, %v2873_v3  ;;  %309 = vst.msk [vmem:[#allocation2 + $0x1a8] sm:$0x3] %vm257_vm1, %v2873_v3 }
  0x30   : > { %312 = vst.msk [vmem:[#allocation2 + $0x1c0] sm:$0x3] %vm257_vm1, %v2873_v3  ;;  %315 = vst.msk [vmem:[#allocation2 + $0x1d8] sm:$0x3] %vm257_vm1, %v2873_v3 }
  0x31   : > { %350 = vst.msk [vmem:[#allocation2 + $0x39] sm:$0xff] %vm254_vm0, %v2969_v1  ;;  %351 = vst.msk [vmem:[#allocation2 + $0x49] sm:$0xff] %vm254_vm0, %v2972_v2 }
  0x32   : > { %352 = vst.msk [vmem:[#allocation2 + $0x51] sm:$0xff] %vm254_vm0, %v319_v4  ;;  %353 = vst.msk [vmem:[#allocation2 + $0x61] sm:$0xff] %vm254_vm0, %v320_v5 }
  0x33   : > { %354 = vst.msk [vmem:[#allocation2 + $0x69] sm:$0xff] %vm254_vm0, %v321_v6  ;;  %355 = vst.msk [vmem:[#allocation2 + $0x79] sm:$0xff] %vm254_vm0, %v322_v7 }
  0x34   : > { %356 = vst.msk [vmem:[#allocation2 + $0x81] sm:$0xff] %vm254_vm0, %v323_v8  ;;  %357 = vst.msk [vmem:[#allocation2 + $0x91] sm:$0xff] %vm254_vm0, %v324_v9 }
  0x35   : > { %358 = vst.msk [vmem:[#allocation2 + $0x99] sm:$0xff] %vm254_vm0, %v325_v10  ;;  %359 = vst.msk [vmem:[#allocation2 + $0xa9] sm:$0xff] %vm254_vm0, %v326_v11 }
  0x36   : > { %360 = vst.msk [vmem:[#allocation2 + $0xb1] sm:$0xff] %vm254_vm0, %v327_v12  ;;  %361 = vst.msk [vmem:[#allocation2 + $0xc1] sm:$0xff] %vm254_vm0, %v328_v13 }
  0x37   : > { %362 = vst.msk [vmem:[#allocation2 + $0xc9] sm:$0xff] %vm254_vm0, %v329_v14  ;;  %363 = vst.msk [vmem:[#allocation2 + $0xd9] sm:$0xff] %vm254_vm0, %v330_v15 }
  0x38   : > { %364 = vst.msk [vmem:[#allocation2 + $0xe1] sm:$0xff] %vm254_vm0, %v331_v16  ;;  %365 = vst.msk [vmem:[#allocation2 + $0xf1] sm:$0xff] %vm254_vm0, %v332_v17 }
  0x39   : > { %366 = vst.msk [vmem:[#allocation2 + $0xf9] sm:$0xff] %vm254_vm0, %v333_v18  ;;  %367 = vst.msk [vmem:[#allocation2 + $0x109] sm:$0xff] %vm254_vm0, %v334_v19 }
  0x3a   : > { %368 = vst.msk [vmem:[#allocation2 + $0x111] sm:$0xff] %vm254_vm0, %v335_v20  ;;  %369 = vst.msk [vmem:[#allocation2 + $0x121] sm:$0xff] %vm254_vm0, %v336_v21 }
  0x3b   : > { %370 = vst.msk [vmem:[#allocation2 + $0x129] sm:$0xff] %vm254_vm0, %v337_v22  ;;  %371 = vst.msk [vmem:[#allocation2 + $0x139] sm:$0xff] %vm254_vm0, %v338_v23 }
  0x3c   : > { %372 = vst.msk [vmem:[#allocation2 + $0x141] sm:$0xff] %vm254_vm0, %v339_v24  ;;  %373 = vst.msk [vmem:[#allocation2 + $0x151] sm:$0xff] %vm254_vm0, %v340_v25 }
  0x3d   : > { %374 = vst.msk [vmem:[#allocation2 + $0x159] sm:$0xff] %vm254_vm0, %v341_v26  ;;  %375 = vst.msk [vmem:[#allocation2 + $0x169] sm:$0xff] %vm254_vm0, %v342_v27 }
  0x3e   : > { %376 = vst.msk [vmem:[#allocation2 + $0x171] sm:$0xff] %vm254_vm0, %v343_v28  ;;  %377 = vst.msk [vmem:[#allocation2 + $0x181] sm:$0xff] %vm254_vm0, %v344_v29 }
  0x3f   : > { %378 = vst.msk [vmem:[#allocation2 + $0x189] sm:$0xff] %vm254_vm0, %v345_v30  ;;  %379 = vst.msk [vmem:[#allocation2 + $0x199] sm:$0xff] %vm254_vm0, %v346_v31 }
  0x40   : > { %380 = vst.msk [vmem:[#allocation2 + $0x1a1] sm:$0xff] %vm254_vm0, %v347_v32 }
  0x41 PF: > { %s2576_s12 = smul.u32 192, %s2855_s18  ;;  %vm567_vm2 = vcmask 1045504   ;;  %vm456_vm3 = vcmask 1046528   ;;  %s2874_s14 = smov 8   ;;  %v420_v61 = vld [vmem:[%s4501_s1] sm:$0xff]  ;;  %v421_v62 = vld [vmem:[%s4501_s1 + $0x8] sm:$0xff] }
  0x42   : > { %s2875_s15 = smov 4   ;;  %s2876_s16 = smov 12   ;;  %v2753_v63 = vpack.c.bf16 %v421_v62, %v420_v61  ;;  %v422_v2 = vld [vmem:[%s4501_s1 + $0x10] sm:$0xff]  ;;  %v423_v3 = vld [vmem:[%s4501_s1 + $0x18] sm:$0xff]  ;;  %v424_v7 = vld [vmem:[%s4501_s1 + $0x20] sm:$0xf] }
  0x43   : > { %s3099_s13 = scalar_lea.vmem [#allocation2], %s2576_s12  ;;  %s2877_s17 = smov 16   ;;  %v2757_v5 = vpack.c.bf16 %v423_v3, %v422_v2  ;;  %vm1299_vm4 = vcmask 1043456   ;;  %vm1064_vm5 = vcmask 31744   ;;  %vm1085_vm6 = vcmask 64512  }
  0x44   : > { %s2878_s19 = smov 20   ;;  %s2879_s29 = smov 24   ;;  %2754 = vmatprep.subr.bf16.mxu0 %v2753_v63  ;;  %vm1106_vm7 = vcmask 97280   ;;  %vm1127_vm8 = vcmask 130048   ;;  %vm1148_vm9 = vcmask 162816   ;;  %vm1169_vm10 = vcmask 195584  }
  0x45   : > { %2756 = vmatpush3.bf16.msra.mxu0 %v2753_v63  ;;  %s2880_s9 = smov 28   ;;  %s2881_s25 = smov 32   ;;  %vm1190_vm11 = vcmask 228352   ;;  %vm1211_vm12 = vcmask 261120   ;;  %vm1238_vm13 = vcmask 293888   ;;  %vm1490_vm14 = vcmask 58368  }
  0x46   : > { %2758 = vmatprep.subr.bf16.mxu0 %v2757_v5 }
  0x47   : > { %v3102_v33 = vld [vmem:[%s3099_s13] sm:$0xff]  ;;  %v3105_v34 = vld [vmem:[%s3099_s13 + $0x8] sm:$0xff]  ;;  %v386_v35 = vld [vmem:[%s3099_s13 + $0x10] sm:$0x3] }
  0x48   : > { %v568_v36 = vrot.slane %v3102_v33, 2  ;;  %v569_v37 = vrot.slane %v3105_v34, 2  ;;  %v457_v38 = vrot.slane %v3102_v33, 1  ;;  %v458_v39 = vrot.slane %v3105_v34, 1  ;;  %v3119_v46 = vld [vmem:[%s3099_s13 + $0x20] sm:$0xff]  ;;  %v3122_v47 = vld [vmem:[%s3099_s13 + $0x18] sm:$0xff] }
  0x49   : > { %v571_v40 = vrot.slane %v386_v35, 2  ;;  %v460_v41 = vrot.slane %v386_v35, 1  ;;  %v462_v48 = vrot.slane %v3122_v47, 1  ;;  %v463_v49 = vrot.slane %v3119_v46, 1  ;;  %v389_v50 = vld [vmem:[%s3099_s13 + $0x28] sm:$0x3]  ;;  %2760 = vmatpush3.bf16.msra.mxu0 %v2757_v5 }
  0x4a   : > { %v570_v42 = vsel %vm567_vm2, %v568_v36, %v569_v37  ;;  %v459_v43 = vsel %vm456_vm3, %v457_v38, %v458_v39  ;;  %v573_v52 = vrot.slane %v3122_v47, 2  ;;  %v574_v53 = vrot.slane %v3119_v46, 2  ;;  %v3145_v58 = vld [vmem:[%s3099_s13 + $0x30] sm:$0xff]  ;;  %v3149_v60 = vld [vmem:[%s3099_s13 + $0x38] sm:$0xff]  ;;  %v392_v6 = vld [vmem:[%s3099_s13 + $0x40] sm:$0x3]  ;;  %2679 = vmatprep.subr.msk.mxu0 %vm1299_vm4, %v424_v7 }
  0x4b   : > { %618 = vrot.lane.b32.xlu1 %v570_v42, %s2874_s14  ;;  %507 = vrot.lane.b32.xlu0 %v459_v43, %s2875_s15  ;;  %v572_v44 = vsel %vm567_vm2, %v569_v37, %v571_v40  ;;  %v461_v45 = vsel %vm456_vm3, %v458_v39, %v460_v41  ;;  %v464_v51 = vsel %vm456_vm3, %v462_v48, %v463_v49  ;;  %v465_v54 = vrot.slane %v389_v50, 1  ;;  %v3196_v15 = vld [vmem:[%s3099_s13 + $0x48] sm:$0xff]  ;;  %v3199_v16 = vld [vmem:[%s3099_s13 + $0x50] sm:$0xff] }
  0x4c   : > { %v575_v55 = vsel %vm567_vm2, %v573_v52, %v574_v53  ;;  %v576_v57 = vrot.slane %v389_v50, 2  ;;  %v467_v0 = vrot.slane %v3145_v58, 1  ;;  %v468_v1 = vrot.slane %v3149_v60, 1  ;;  %v395_v20 = vld [vmem:[%s3099_s13 + $0x58] sm:$0x3]  ;;  %v3231_v28 = vld [vmem:[%s3099_s13 + $0x60] sm:$0xff] }
  0x4d   : > { %v466_v56 = vsel %vm456_vm3, %v463_v49, %v465_v54  ;;  %v578_v8 = vrot.slane %v3145_v58, 2  ;;  %v579_v9 = vrot.slane %v3149_v60, 2  ;;  %v470_v10 = vrot.slane %v392_v6, 1  ;;  %2680 = vmatpush3.msk.msra.mxu0 %vm1299_vm4, %v424_v7  ;;  %v3234_v29 = vld [vmem:[%s3099_s13 + $0x68] sm:$0xff]  ;;  %v398_v35 = vld [vmem:[%s3099_s13 + $0x70] sm:$0x3] }
  0x4e   : > { %v577_v59 = vsel %vm567_vm2, %v574_v53, %v576_v57  ;;  %v469_v4 = vsel %vm456_vm3, %v467_v0, %v468_v1  ;;  %v581_v13 = vrot.slane %v392_v6, 2  ;;  %v472_v17 = vrot.slane %v3196_v15, 1  ;;  %v3273_v50 = vld [vmem:[%s3099_s13 + $0x80] sm:$0xff] }
  0x4f   : > { %620 = vrot.lane.b32.xlu1 %v572_v44, %s2874_s14  ;;  %509 = vrot.lane.b32.xlu0 %v461_v45, %s2875_s15  ;;  %v580_v11 = vsel %vm567_vm2, %v578_v8, %v579_v9  ;;  %v471_v12 = vsel %vm456_vm3, %v468_v1, %v470_v10  ;;  %v473_v18 = vrot.slane %v3199_v16, 1  ;;  %v583_v21 = vrot.slane %v3196_v15, 2  ;;  %v3266_v45 = vld [vmem:[%s3099_s13 + $0x78] sm:$0xff] }
  0x50   : > { %v582_v14 = vsel %vm567_vm2, %v579_v9, %v581_v13  ;;  %v584_v22 = vrot.slane %v3199_v16, 2  ;;  %v475_v23 = vrot.slane %v395_v20, 1  ;;  %v586_v26 = vrot.slane %v395_v20, 2 }
  0x51   : > { %v474_v19 = vsel %vm456_vm3, %v472_v17, %v473_v18  ;;  %v477_v30 = vrot.slane %v3231_v28, 1  ;;  %v478_v31 = vrot.slane %v3234_v29, 1  ;;  %v588_v36 = vrot.slane %v3231_v28, 2 }
  0x52   : > { %v585_v24 = vsel %vm567_vm2, %v583_v21, %v584_v22  ;;  %v476_v25 = vsel %vm456_vm3, %v473_v18, %v475_v23  ;;  %v587_v27 = vsel %vm567_vm2, %v584_v22, %v586_v26  ;;  %v589_v37 = vrot.slane %v3234_v29, 2  ;;  %v3320_v18 = vld [vmem:[%s3099_s13 + $0x90] sm:$0xff]  ;;  %v3328_v21 = vld [vmem:[%s3099_s13 + $0x98] sm:$0xff] }
  0x53   : > { %682 = vrot.lane.b32.xlu1 %v3119_v46, %s2876_s16  ;;  %680 = vrot.lane.b32.xlu0 %v3122_v47, %s2876_s16  ;;  %v479_v32 = vsel %vm456_vm3, %v477_v30, %v478_v31  ;;  %v480_v38 = vrot.slane %v398_v35, 1  ;;  %v591_v41 = vrot.slane %v398_v35, 2  ;;  %v483_v52 = vrot.slane %v3273_v50, 1 }
  0x54   : > { %v590_v39 = vsel %vm567_vm2, %v588_v36, %v589_v37  ;;  %v593_v61 = vrot.slane %v3266_v45, 2  ;;  %v594_v62 = vrot.slane %v3273_v50, 2  ;;  %v488_v26 = vrot.slane %v3328_v21, 1 }
  0x55   : > { %v481_v40 = vsel %vm456_vm3, %v478_v31, %v480_v38  ;;  %v592_v42 = vsel %vm567_vm2, %v589_v37, %v591_v41 }
  0x56   : > { %v595_v2 = vsel %vm567_vm2, %v593_v61, %v594_v62 }
  0x57   : > { %511 = vrot.lane.b32.xlu1 %v464_v51, %s2875_s15  ;;  %746 = vrot.lane.b32.xlu0 %v464_v51, %s2877_s17  ;;  %v482_v51 = vrot.slane %v3266_v45, 1 }
  0x5b   : > { %811 = vrot.lane.b32.xlu1 %v575_v55, %s2878_s19  ;;  %748 = vrot.lane.b32.xlu0 %v466_v56, %s2877_s17 }
  0x5f   : > { %622 = vrot.lane.b32.xlu1 %v575_v55, %s2874_s14  ;;  %513 = vrot.lane.b32.xlu0 %v466_v56, %s2875_s15  ;;  %v484_v55 = vsel %vm456_vm3, %v482_v51, %v483_v52 }
  0x63   : > { %873 = vrot.lane.b32.xlu1 %v3145_v58, %s2879_s29  ;;  %813 = vrot.lane.b32.xlu0 %v577_v59, %s2878_s19 }
  0x67   : > { %684 = vrot.lane.b32.xlu1 %v3145_v58, %s2876_s16  ;;  %624 = vrot.lane.b32.xlu0 %v577_v59, %s2874_s14  ;;  %v401_v59 = vld [vmem:[%s3099_s13 + $0x88] sm:$0x3] }
  0x68   : > { %v485_v63 = vrot.slane %v401_v59, 1  ;;  %v596_v6 = vrot.slane %v401_v59, 2 }
  0x6a   : > { %v486_v3 = vsel %vm456_vm3, %v483_v52, %v485_v63  ;;  %v597_v9 = vsel %vm567_vm2, %v594_v62, %v596_v6 }
  0x6b   : > { %939 = vrot.lane.b32.xlu1 %v469_v4, %s2880_s9  ;;  %875 = vrot.lane.b32.xlu0 %v3149_v60, %s2879_s29 }
  0x6f   : > { %750 = vrot.lane.b32.xlu1 %v469_v4, %s2877_s17  ;;  %686 = vrot.lane.b32.xlu0 %v3149_v60, %s2876_s16 }
  0x73   : > { %1004 = vrot.lane.b32.xlu1 %v580_v11, %s2881_s25  ;;  %941 = vrot.lane.b32.xlu0 %v471_v12, %s2880_s9 }
  0x77   : > { %752 = vrot.lane.b32.xlu1 %v471_v12, %s2877_s17  ;;  %515 = vrot.lane.b32.xlu0 %v469_v4, %s2875_s15 }
  0x7b   : > { %1006 = vrot.lane.b32.xlu1 %v582_v14, %s2881_s25  ;;  %815 = vrot.lane.b32.xlu0 %v580_v11, %s2878_s19 }
  0x7f   : > { %626 = vrot.lane.b32.xlu1 %v580_v11, %s2874_s14  ;;  %517 = vrot.lane.b32.xlu0 %v471_v12, %s2875_s15 }
  0x83   : > { %877 = vrot.lane.b32.xlu1 %v3196_v15, %s2879_s29  ;;  %817 = vrot.lane.b32.xlu0 %v582_v14, %s2878_s19 }
  0x87   : > { %688 = vrot.lane.b32.xlu1 %v3196_v15, %s2876_s16  ;;  %628 = vrot.lane.b32.xlu0 %v582_v14, %s2874_s14 }
  0x8b   : > { %943 = vrot.lane.b32.xlu1 %v474_v19, %s2880_s9  ;;  %879 = vrot.lane.b32.xlu0 %v3199_v16, %s2879_s29 }
  0x8f   : > { %754 = vrot.lane.b32.xlu1 %v474_v19, %s2877_s17  ;;  %690 = vrot.lane.b32.xlu0 %v3199_v16, %s2876_s16 }
  0x93   : > { %1008 = vrot.lane.b32.xlu1 %v585_v24, %s2881_s25  ;;  %945 = vrot.lane.b32.xlu0 %v476_v25, %s2880_s9 }
  0x97   : > { %756 = vrot.lane.b32.xlu1 %v476_v25, %s2877_s17  ;;  %519 = vrot.lane.b32.xlu0 %v474_v19, %s2875_s15 }
  0x9b   : > { %1010 = vrot.lane.b32.xlu1 %v587_v27, %s2881_s25  ;;  %819 = vrot.lane.b32.xlu0 %v585_v24, %s2878_s19 }
  0x9f   : > { %630 = vrot.lane.b32.xlu1 %v585_v24, %s2874_s14  ;;  %521 = vrot.lane.b32.xlu0 %v476_v25, %s2875_s15  ;;  %v487_v25 = vrot.slane %v3320_v18, 1 }
  0xa1   : > { %v489_v37 = vsel %vm456_vm3, %v487_v25, %v488_v26 }
  0xa3   : > { %881 = vrot.lane.b32.xlu1 %v3231_v28, %s2879_s29  ;;  %821 = vrot.lane.b32.xlu0 %v587_v27, %s2878_s19 }
  0xa7   : > { %692 = vrot.lane.b32.xlu1 %v3231_v28, %s2876_s16  ;;  %632 = vrot.lane.b32.xlu0 %v587_v27, %s2874_s14 }
  0xab   : > { %947 = vrot.lane.b32.xlu1 %v479_v32, %s2880_s9  ;;  %883 = vrot.lane.b32.xlu0 %v3234_v29, %s2879_s29 }
  0xaf   : > { %758 = vrot.lane.b32.xlu1 %v479_v32, %s2877_s17  ;;  %694 = vrot.lane.b32.xlu0 %v3234_v29, %s2876_s16 }
  0xb3   : > { %1012 = vrot.lane.b32.xlu1 %v590_v39, %s2881_s25  ;;  %949 = vrot.lane.b32.xlu0 %v481_v40, %s2880_s9 }
  0xb7   : > { %760 = vrot.lane.b32.xlu1 %v481_v40, %s2877_s17  ;;  %523 = vrot.lane.b32.xlu0 %v479_v32, %s2875_s15 }
  0xbb   : > { %1014 = vrot.lane.b32.xlu1 %v592_v42, %s2881_s25  ;;  %823 = vrot.lane.b32.xlu0 %v590_v39, %s2878_s19 }
  0xbd   : > { %v619_v43 = vpop.permute.xlu1 %618  ;;  %v508_v44 = vpop.permute.xlu0 %507 }
  0xbe   : > { %v1065_v12 = vsel %vm1064_vm5, %v3102_v33, %v508_v44  ;;  %v598_v44 = vrot.slane %v3320_v18, 2 }
  0xbf   : > { %634 = vrot.lane.b32.xlu1 %v590_v39, %s2874_s14  ;;  %525 = vrot.lane.b32.xlu0 %v481_v40, %s2875_s15  ;;  %v1086_v17 = vsel %vm1085_vm6, %v1065_v12, %v619_v43  ;;  %v404_v40 = vld [vmem:[%s3099_s13 + $0xa0] sm:$0x3]  ;;  %v3396_v12 = vld [vmem:[%s3099_s13 + $0xa8] sm:$0xff] }
  0xc0   : > { %v601_v62 = vrot.slane %v404_v40, 2 }
  0xc1   : > { %v3268_v48 = vpop.permute.xlu1 %620  ;;  %v3270_v49 = vpop.permute.xlu0 %509 }
  0xc2   : > { %v1066_v27 = vsel %vm1064_vm5, %v3105_v34, %v3270_v49  ;;  %v490_v49 = vrot.slane %v404_v40, 1 }
  0xc3   : > { %885 = vrot.lane.b32.xlu1 %v3266_v45, %s2879_s29  ;;  %825 = vrot.lane.b32.xlu0 %v592_v42, %s2878_s19  ;;  %v1087_v36 = vsel %vm1085_vm6, %v1066_v27, %v3268_v48  ;;  %v599_v48 = vrot.slane %v3328_v21, 2 }
  0xc5   : > { %v3280_v53 = vpop.permute.xlu1 %682  ;;  %v681_v54 = vpop.permute.xlu0 %680 }
  0xc6   : > { %v1107_v19 = vsel %vm1106_vm7, %v1086_v17, %v681_v54  ;;  %v1108_v34 = vsel %vm1106_vm7, %v1087_v36, %v3280_v53 }
  0xc7   : > { %696 = vrot.lane.b32.xlu1 %v3266_v45, %s2876_s16  ;;  %636 = vrot.lane.b32.xlu0 %v592_v42, %s2874_s14 }
  0xc9   : > { %v3286_v56 = vpop.permute.xlu1 %511  ;;  %v747_v57 = vpop.permute.xlu0 %746 }
  0xca   : > { %v1128_v22 = vsel %vm1127_vm8, %v1107_v19, %v747_v57  ;;  %v491_v57 = vsel %vm456_vm3, %v488_v26, %v490_v49  ;;  %v3405_v19 = vld [vmem:[%s3099_s13 + $0xb0] sm:$0xff] }
  0xcb   : > { %951 = vrot.lane.b32.xlu1 %v484_v55, %s2880_s9  ;;  %887 = vrot.lane.b32.xlu0 %v3273_v50, %s2879_s29 }
  0xcd   : > { %v812_v0 = vpop.permute.xlu1 %811  ;;  %v749_v1 = vpop.permute.xlu0 %748 }
  0xce   : > { %v1149_v23 = vsel %vm1148_vm9, %v1128_v22, %v812_v0  ;;  %v1129_v41 = vsel %vm1127_vm8, %v1108_v34, %v749_v1  ;;  %v602_v1 = vsel %vm567_vm2, %v599_v48, %v601_v62  ;;  %v493_v22 = vrot.slane %v3405_v19, 1 }
  0xcf   : > { %762 = vrot.lane.b32.xlu1 %v484_v55, %s2877_s17  ;;  %698 = vrot.lane.b32.xlu0 %v3273_v50, %s2876_s16 }
  0xd1   : > { %v3299_v4 = vpop.permute.xlu1 %622  ;;  %v3301_v5 = vpop.permute.xlu0 %513 }
  0xd2   : > { %v1068_v26 = vsel %vm1064_vm5, %v3119_v46, %v3301_v5  ;;  %v407_v46 = vld [vmem:[%s3099_s13 + $0xb8] sm:$0x3] }
  0xd3   : > { %1016 = vrot.lane.b32.xlu1 %v595_v2, %s2881_s25  ;;  %953 = vrot.lane.b32.xlu0 %v486_v3, %s2880_s9  ;;  %v495_v34 = vrot.slane %v407_v46, 1 }
  0xd5   : > { %v874_v7 = vpop.permute.xlu1 %873  ;;  %v814_v8 = vpop.permute.xlu0 %813 }
  0xd6   : > { %v1170_v24 = vsel %vm1169_vm10, %v1149_v23, %v874_v7  ;;  %v1150_v42 = vsel %vm1148_vm9, %v1129_v41, %v814_v8  ;;  %v1067_v8 = vsel %vm1064_vm5, %v3122_v47, %v3286_v56 }
  0xd7   : > { %764 = vrot.lane.b32.xlu1 %v486_v3, %s2877_s17  ;;  %527 = vrot.lane.b32.xlu0 %v484_v55, %s2875_s15  ;;  %v600_v55 = vsel %vm567_vm2, %v598_v44, %v599_v48  ;;  %v496_v44 = vsel %vm456_vm3, %v493_v22, %v495_v34 }
  0xd9   : > { %v3308_v10 = vpop.permute.xlu1 %684  ;;  %v3310_v11 = vpop.permute.xlu0 %624 }
  0xda   : > { %v1089_v27 = vsel %vm1085_vm6, %v1068_v26, %v3310_v11 }
  0xdb   : > { %1018 = vrot.lane.b32.xlu1 %v597_v9, %s2881_s25  ;;  %827 = vrot.lane.b32.xlu0 %v595_v2, %s2878_s19 }
  0xdd   : > { %v940_v13 = vpop.permute.xlu1 %939  ;;  %v876_v14 = vpop.permute.xlu0 %875 }
  0xde   : > { %v1191_v30 = vsel %vm1190_vm11, %v1170_v24, %v940_v13  ;;  %v1171_v43 = vsel %vm1169_vm10, %v1150_v42, %v876_v14 }
  0xdf   : > { %638 = vrot.lane.b32.xlu1 %v595_v2, %s2874_s14  ;;  %529 = vrot.lane.b32.xlu0 %v486_v3, %s2875_s15 }
  0xe1   : > { %v3323_v20 = vpop.permute.xlu1 %750  ;;  %v3325_v33 = vpop.permute.xlu0 %686 }
  0xe3   : > { %889 = vrot.lane.b32.xlu1 %v3320_v18, %s2879_s29  ;;  %829 = vrot.lane.b32.xlu0 %v597_v9, %s2878_s19 }
  0xe5   : > { %v1005_v31 = vpop.permute.xlu1 %1004  ;;  %v942_v32 = vpop.permute.xlu0 %941 }
  0xe6   : > { %v1212_v35 = vsel %vm1211_vm12, %v1191_v30, %v1005_v31  ;;  %v1192_v51 = vsel %vm1190_vm11, %v1171_v43, %v942_v32  ;;  %v1110_v31 = vsel %vm1106_vm7, %v1089_v27, %v3325_v33  ;;  %v604_v33 = vrot.slane %v3405_v19, 2 }
  0xe7   : > { %700 = vrot.lane.b32.xlu1 %v3320_v18, %s2876_s16  ;;  %640 = vrot.lane.b32.xlu0 %v597_v9, %s2874_s14  ;;  %v1088_v9 = vsel %vm1085_vm6, %v1067_v8, %v3299_v4 }
  0xe8   : > { %2681 = vmatprep.mubr.msk.f32.mxu0 %vm1238_vm13, %v1212_v35  ;;  %v1109_v13 = vsel %vm1106_vm7, %v1088_v9, %v3308_v10  ;;  %v492_v10 = vrot.slane %v3396_v12, 1 }
  0xe9   : > { %v3352_v38 = vpop.permute.xlu1 %752  ;;  %v3354_v39 = vpop.permute.xlu0 %515  ;;  %v1130_v47 = vsel %vm1127_vm8, %v1109_v13, %v3323_v20  ;;  %v3484_v13 = vld [vmem:[%s3099_s13 + $0xc8] sm:$0xff] }
  0xea   : > { %v494_v30 = vsel %vm456_vm3, %v492_v10, %v493_v22  ;;  %v1131_v5 = vsel %vm1127_vm8, %v1110_v31, %v3352_v38 }
  0xeb   : > { %955 = vrot.lane.b32.xlu1 %v489_v37, %s2880_s9  ;;  %891 = vrot.lane.b32.xlu0 %v3328_v21, %s2879_s29 }
  0xed   : > { %v1007_v52 = vpop.permute.xlu1 %1006  ;;  %v816_v53 = vpop.permute.xlu0 %815 }
  0xee   : > { %v1213_v54 = vsel %vm1211_vm12, %v1192_v51, %v1007_v52  ;;  %v1151_v56 = vsel %vm1148_vm9, %v1130_v47, %v816_v53  ;;  %v606_v51 = vrot.slane %v407_v46, 2  ;;  %v498_v47 = vrot.slane %v3484_v13, 1 }
  0xef   : > { %766 = vrot.lane.b32.xlu1 %v489_v37, %s2877_s17  ;;  %702 = vrot.lane.b32.xlu0 %v3328_v21, %s2876_s16 }
  0xf0   : > { %2682 = vmatmul.mubr.msk.f32.vlgmr.msra.gmra.mrb[0].mxu0 %vm1238_vm13, %v1213_v54  ;;  %v607_v54 = vsel %vm567_vm2, %v604_v33, %v606_v51 }
  0xf1   : > { %v3373_v59 = vpop.permute.xlu1 %626  ;;  %v3375_v61 = vpop.permute.xlu0 %517 }
  0xf2   : > { %v1070_v22 = vsel %vm1064_vm5, %v3149_v60, %v3375_v61  ;;  %v410_v60 = vld [vmem:[%s3099_s13 + $0xd0] sm:$0x3] }
  0xf3   : > { %1020 = vrot.lane.b32.xlu1 %v600_v55, %s2881_s25  ;;  %957 = vrot.lane.b32.xlu0 %v491_v57, %s2880_s9  ;;  %v500_v31 = vrot.slane %v410_v60, 1 }
  0xf5   : > { %v878_v63 = vpop.permute.xlu1 %877  ;;  %v818_v0 = vpop.permute.xlu0 %817 }
  0xf6   : > { %v1172_v4 = vsel %vm1169_vm10, %v1151_v56, %v878_v63  ;;  %v1152_v36 = vsel %vm1148_vm9, %v1131_v5, %v818_v0  ;;  %v1069_v0 = vsel %vm1064_vm5, %v3145_v58, %v3354_v39 }
  0xf7   : > { %768 = vrot.lane.b32.xlu1 %v491_v57, %s2877_s17  ;;  %531 = vrot.lane.b32.xlu0 %v489_v37, %s2875_s15  ;;  %v603_v37 = vrot.slane %v3396_v12, 2 }
  0xf9   : > { %v3382_v2 = vpop.permute.xlu1 %688  ;;  %v3384_v3 = vpop.permute.xlu0 %628  ;;  %v605_v43 = vsel %vm567_vm2, %v603_v37, %v604_v33  ;;  %v501_v37 = vsel %vm456_vm3, %v498_v47, %v500_v31 }
  0xfb   : > { %1022 = vrot.lane.b32.xlu1 %v602_v1, %s2881_s25  ;;  %831 = vrot.lane.b32.xlu0 %v600_v55, %s2878_s19 }
  0xfd   : > { %v944_v6 = vpop.permute.xlu1 %943  ;;  %v880_v7 = vpop.permute.xlu0 %879 }
  0xfe   : > { %v1193_v23 = vsel %vm1190_vm11, %v1172_v4, %v944_v6  ;;  %v1173_v11 = vsel %vm1169_vm10, %v1152_v36, %v880_v7  ;;  %v3475_v6 = vld [vmem:[%s3099_s13 + $0xc0] sm:$0xff] }
  0xff   : > { %642 = vrot.lane.b32.xlu1 %v600_v55, %s2874_s14  ;;  %533 = vrot.lane.b32.xlu0 %v491_v57, %s2875_s15 }
 0x101   : > { %v3400_v14 = vpop.permute.xlu1 %754  ;;  %v3402_v17 = vpop.permute.xlu0 %690 }
 0x103   : > { %893 = vrot.lane.b32.xlu1 %v3396_v12, %s2879_s29  ;;  %833 = vrot.lane.b32.xlu0 %v602_v1, %s2878_s19 }
 0x105   : > { %v1009_v24 = vpop.permute.xlu1 %1008  ;;  %v946_v25 = vpop.permute.xlu0 %945 }
 0x106   : > { %v1214_v20 = vsel %vm1211_vm12, %v1193_v23, %v1009_v24  ;;  %v1194_v40 = vsel %vm1190_vm11, %v1173_v11, %v946_v25  ;;  %v1091_v23 = vsel %vm1085_vm6, %v1070_v22, %v3384_v3  ;;  %v413_v22 = vld [vmem:[%s3099_s13 + $0xe8] sm:$0x3] }
 0x107   : > { %704 = vrot.lane.b32.xlu1 %v3396_v12, %s2876_s16  ;;  %644 = vrot.lane.b32.xlu0 %v602_v1, %s2874_s14  ;;  %v1090_v1 = vsel %vm1085_vm6, %v1069_v0, %v3373_v59  ;;  %v1112_v25 = vsel %vm1106_vm7, %v1091_v23, %v3402_v17  ;;  %v609_v17 = vrot.slane %v3484_v13, 2 }
 0x108   : > { %2684 = vmatprep.mubr.msk.f32.mxu0 %vm1238_vm13, %v1214_v20  ;;  %v1111_v7 = vsel %vm1106_vm7, %v1090_v1, %v3382_v2  ;;  %v497_v2 = vrot.slane %v3475_v6, 1 }
 0x109   : > { %v3430_v32 = vpop.permute.xlu1 %756  ;;  %v3432_v35 = vpop.permute.xlu0 %519  ;;  %v1132_v58 = vsel %vm1127_vm8, %v1111_v7, %v3400_v14  ;;  %v3567_v7 = vld [vmem:[%s3099_s13 + $0xe0] sm:$0xff] }
 0x10a   : > { %v499_v24 = vsel %vm456_vm3, %v497_v2, %v498_v47  ;;  %v1133_v61 = vsel %vm1127_vm8, %v1112_v25, %v3430_v32  ;;  %v614_v25 = vrot.slane %v3567_v7, 2 }
 0x10b   : > { %959 = vrot.lane.b32.xlu1 %v494_v30, %s2880_s9  ;;  %895 = vrot.lane.b32.xlu0 %v3405_v19, %s2879_s29 }
 0x10d   : > { %v1011_v41 = vpop.permute.xlu1 %1010  ;;  %v820_v42 = vpop.permute.xlu0 %819 }
 0x10e   : > { %v1215_v38 = vsel %vm1211_vm12, %v1194_v40, %v1011_v41  ;;  %v1153_v39 = vsel %vm1148_vm9, %v1132_v58, %v820_v42  ;;  %v611_v40 = vrot.slane %v410_v60, 2  ;;  %v503_v58 = vrot.slane %v3567_v7, 1 }
 0x10f   : > { %770 = vrot.lane.b32.xlu1 %v494_v30, %s2877_s17  ;;  %706 = vrot.lane.b32.xlu0 %v3405_v19, %s2876_s16  ;;  %v505_v60 = vrot.slane %v413_v22, 1 }
 0x110   : > { %2685 = vmatmul.mubr.msk.f32.gmra.mrb[2].mxu0 %vm1238_vm13, %v1215_v38  ;;  %v612_v38 = vsel %vm567_vm2, %v609_v17, %v611_v40 }
 0x111   : > { %v3452_v48 = vpop.permute.xlu1 %630  ;;  %v3454_v49 = vpop.permute.xlu0 %521 }
 0x113   : > { %1024 = vrot.lane.b32.xlu1 %v605_v43, %s2881_s25  ;;  %961 = vrot.lane.b32.xlu0 %v496_v44, %s2880_s9 }
 0x115   : > { %v882_v52 = vpop.permute.xlu1 %881  ;;  %v822_v53 = vpop.permute.xlu0 %821 }
 0x116   : > { %v1174_v59 = vsel %vm1169_vm10, %v1153_v39, %v882_v52  ;;  %v1154_v27 = vsel %vm1148_vm9, %v1133_v61, %v822_v53  ;;  %v1071_v53 = vsel %vm1064_vm5, %v3196_v15, %v3432_v35 }
 0x117   : > { %772 = vrot.lane.b32.xlu1 %v496_v44, %s2877_s17  ;;  %535 = vrot.lane.b32.xlu0 %v494_v30, %s2875_s15  ;;  %v608_v30 = vrot.slane %v3475_v6, 2 }
 0x119   : > { %v3461_v55 = vpop.permute.xlu1 %692  ;;  %v3463_v57 = vpop.permute.xlu0 %632  ;;  %v610_v11 = vsel %vm567_vm2, %v608_v30, %v609_v17  ;;  %v506_v17 = vsel %vm456_vm3, %v503_v58, %v505_v60 }
 0x11b   : > { %1026 = vrot.lane.b32.xlu1 %v607_v54, %s2881_s25  ;;  %835 = vrot.lane.b32.xlu0 %v605_v43, %s2878_s19 }
 0x11d   : > { %v948_v62 = vpop.permute.xlu1 %947  ;;  %v884_v63 = vpop.permute.xlu0 %883 }
 0x11e   : > { %v1195_v56 = vsel %vm1190_vm11, %v1174_v59, %v948_v62  ;;  %v1175_v3 = vsel %vm1169_vm10, %v1154_v27, %v884_v63  ;;  %v3558_v62 = vld [vmem:[%s3099_s13 + $0xd8] sm:$0xff] }
 0x11f   : > { %646 = vrot.lane.b32.xlu1 %v605_v43, %s2874_s14  ;;  %537 = vrot.lane.b32.xlu0 %v496_v44, %s2875_s15 }
 0x121   : > { %v3479_v8 = vpop.permute.xlu1 %758  ;;  %v3481_v9 = vpop.permute.xlu0 %694 }
 0x123   : > { %897 = vrot.lane.b32.xlu1 %v3475_v6, %s2879_s29  ;;  %837 = vrot.lane.b32.xlu0 %v607_v54, %s2878_s19 }
 0x125   : > { %v1013_v4 = vpop.permute.xlu1 %1012  ;;  %v950_v10 = vpop.permute.xlu0 %949 }
 0x126   : > { %v1216_v14 = vsel %vm1211_vm12, %v1195_v56, %v1013_v4  ;;  %v1196_v46 = vsel %vm1190_vm11, %v1175_v3, %v950_v10  ;;  %v2882_v56 = vmov 0.0  }
 0x127   : > { %708 = vrot.lane.b32.xlu1 %v3475_v6, %s2876_s16  ;;  %648 = vrot.lane.b32.xlu0 %v607_v54, %s2874_s14  ;;  %v1092_v54 = vsel %vm1085_vm6, %v1071_v53, %v3452_v48  ;;  %1489 = vst.msk [vmem:[#allocation3 + $0x8] sm:$0xff] %vm1085_vm6, %v2882_v56  ;;  %1488 = vst.msk [vmem:[#allocation3] sm:$0xff] %vm1085_vm6, %v2882_v56 }
 0x128   : > { %2687 = vmatprep.mubr.msk.f32.mxu0 %vm1238_vm13, %v1216_v14  ;;  %v1113_v63 = vsel %vm1106_vm7, %v1092_v54, %v3461_v55  ;;  %v502_v55 = vrot.slane %v3558_v62, 1  ;;  %1491 = vst.msk [vmem:[#allocation3 + $0x10] sm:$0x3] %vm1490_vm14, %v2882_v56  ;;  %1494 = vst.msk [vmem:[#allocation3 + $0x28] sm:$0x3] %vm1490_vm14, %v2882_v56 }
 0x129   : > { %v3509_v20 = vpop.permute.xlu1 %760  ;;  %v3511_v26 = vpop.permute.xlu0 %523  ;;  %v1134_v15 = vsel %vm1127_vm8, %v1113_v63, %v3479_v8  ;;  %v1072_v8 = vsel %vm1064_vm5, %v3199_v16, %v3454_v49  ;;  %1492 = vst.msk [vmem:[#allocation3 + $0x18] sm:$0xff] %vm1085_vm6, %v2882_v56  ;;  %1493 = vst.msk [vmem:[#allocation3 + $0x20] sm:$0xff] %vm1085_vm6, %v2882_v56 }
 0x12a   : > { %1495 = vst.msk [vmem:[#allocation3 + $0x30] sm:$0xff] %vm1085_vm6, %v2882_v56  ;;  %1496 = vst.msk [vmem:[#allocation3 + $0x38] sm:$0xff] %vm1085_vm6, %v2882_v56  ;;  %v1093_v16 = vsel %vm1085_vm6, %v1072_v8, %v3463_v57  ;;  %v504_v49 = vsel %vm456_vm3, %v502_v55, %v503_v58 }
 0x12b   : > { %963 = vrot.lane.b32.xlu1 %v499_v24, %s2880_s9  ;;  %899 = vrot.lane.b32.xlu0 %v3484_v13, %s2879_s29  ;;  %1497 = vst.msk [vmem:[#allocation3 + $0x40] sm:$0x3] %vm1490_vm14, %v2882_v56  ;;  %1500 = vst.msk [vmem:[#allocation3 + $0x58] sm:$0x3] %vm1490_vm14, %v2882_v56  ;;  %v1114_v4 = vsel %vm1106_vm7, %v1093_v16, %v3481_v9  ;;  %v613_v9 = vrot.slane %v3558_v62, 2 }
 0x12c   : > { %1498 = vst.msk [vmem:[#allocation3 + $0x48] sm:$0xff] %vm1085_vm6, %v2882_v56  ;;  %1499 = vst.msk [vmem:[#allocation3 + $0x50] sm:$0xff] %vm1085_vm6, %v2882_v56  ;;  %v1135_v23 = vsel %vm1127_vm8, %v1114_v4, %v3509_v20  ;;  %v416_v16 = vld [vmem:[%s3099_s13 + $0x100] sm:$0x3] }
 0x12d   : > { %v1015_v5 = vpop.permute.xlu1 %1014  ;;  %v824_v36 = vpop.permute.xlu0 %823  ;;  %1501 = vst.msk [vmem:[#allocation3 + $0x60] sm:$0xff] %vm1085_vm6, %v2882_v56  ;;  %1502 = vst.msk [vmem:[#allocation3 + $0x68] sm:$0xff] %vm1085_vm6, %v2882_v56  ;;  %v615_v30 = vsel %vm567_vm2, %v613_v9, %v614_v25 }
 0x12e   : > { %v1217_v32 = vsel %vm1211_vm12, %v1196_v46, %v1015_v5  ;;  %v1155_v35 = vsel %vm1148_vm9, %v1134_v15, %v824_v36  ;;  %1503 = vst.msk [vmem:[#allocation3 + $0x70] sm:$0x3] %vm1490_vm14, %v2882_v56  ;;  %1506 = vst.msk [vmem:[#allocation3 + $0x88] sm:$0x3] %vm1490_vm14, %v2882_v56  ;;  %v616_v5 = vrot.slane %v413_v22, 2  ;;  %v415_v15 = vld [vmem:[%s3099_s13 + $0xf8] sm:$0xff] }
 0x12f   : > { %774 = vrot.lane.b32.xlu1 %v499_v24, %s2877_s17  ;;  %710 = vrot.lane.b32.xlu0 %v3484_v13, %s2876_s16  ;;  %1504 = vst.msk [vmem:[#allocation3 + $0x78] sm:$0xff] %vm1085_vm6, %v2882_v56  ;;  %1505 = vst.msk [vmem:[#allocation3 + $0x80] sm:$0xff] %vm1085_vm6, %v2882_v56  ;;  %v807_v4 = vrot.slane %v415_v15, 2  ;;  %v744_v22 = vrot.slane %v416_v16, 1 }
 0x130   : > { %2688 = vmatmul.mubr.msk.f32.gmra.mrb[4].mxu0 %vm1238_vm13, %v1217_v32  ;;  %1507 = vst.msk [vmem:[#allocation3 + $0x90] sm:$0xff] %vm1085_vm6, %v2882_v56  ;;  %1508 = vst.msk [vmem:[#allocation3 + $0x98] sm:$0xff] %vm1085_vm6, %v2882_v56 }
 0x131   : > { %v3531_v33 = vpop.permute.xlu1 %634  ;;  %v3533_v34 = vpop.permute.xlu0 %525  ;;  %1509 = vst.msk [vmem:[#allocation3 + $0xa0] sm:$0x3] %vm1490_vm14, %v2882_v56  ;;  %1512 = vst.msk [vmem:[#allocation3 + $0xb8] sm:$0x3] %vm1490_vm14, %v2882_v56 }
 0x132   : > { %1510 = vst.msk [vmem:[#allocation3 + $0xa8] sm:$0xff] %vm1085_vm6, %v2882_v56  ;;  %1511 = vst.msk [vmem:[#allocation3 + $0xb0] sm:$0xff] %vm1085_vm6, %v2882_v56 }
 0x133   : > { %1028 = vrot.lane.b32.xlu1 %v610_v11, %s2881_s25  ;;  %965 = vrot.lane.b32.xlu0 %v501_v37, %s2880_s9  ;;  %1513 = vst.msk [vmem:[#allocation3 + $0xc0] sm:$0xff] %vm1085_vm6, %v2882_v56  ;;  %1514 = vst.msk [vmem:[#allocation3 + $0xc8] sm:$0xff] %vm1085_vm6, %v2882_v56 }
 0x134   : > { %1515 = vst.msk [vmem:[#allocation3 + $0xd0] sm:$0x3] %vm1490_vm14, %v2882_v56  ;;  %1518 = vst.msk [vmem:[#allocation3 + $0xe8] sm:$0x3] %vm1490_vm14, %v2882_v56 }
 0x135   : > { %v886_v41 = vpop.permute.xlu1 %885  ;;  %v3537_v42 = vpop.permute.xlu0 %825  ;;  %1516 = vst.msk [vmem:[#allocation3 + $0xd8] sm:$0xff] %vm1085_vm6, %v2882_v56  ;;  %1517 = vst.msk [vmem:[#allocation3 + $0xe0] sm:$0xff] %vm1085_vm6, %v2882_v56 }
 0x136   : > { %v1176_v48 = vsel %vm1169_vm10, %v1155_v35, %v886_v41  ;;  %v1156_v57 = vsel %vm1148_vm9, %v1135_v23, %v3537_v42 }
 0x137   : > { %776 = vrot.lane.b32.xlu1 %v501_v37, %s2877_s17  ;;  %539 = vrot.lane.b32.xlu0 %v499_v24, %s2875_s15 }
 0x139   : > { %v3542_v43 = vpop.permute.xlu1 %696  ;;  %v3544_v44 = vpop.permute.xlu0 %636 }
 0x13b   : > { %1030 = vrot.lane.b32.xlu1 %v612_v38, %s2881_s25  ;;  %839 = vrot.lane.b32.xlu0 %v610_v11, %s2878_s19 }
 0x13d   : > { %v952_v51 = vpop.permute.xlu1 %951  ;;  %v3548_v52 = vpop.permute.xlu0 %887 }
 0x13e   : > { %v1197_v39 = vsel %vm1190_vm11, %v1176_v48, %v952_v51  ;;  %v1177_v24 = vsel %vm1169_vm10, %v1156_v57, %v3548_v52  ;;  %v414_v52 = vld [vmem:[%s3099_s13 + $0xf0] sm:$0xff]  ;;  %v742_v48 = vrot.slane %v415_v15, 1 }
 0x13f   : > { %650 = vrot.lane.b32.xlu1 %v610_v11, %s2874_s14  ;;  %541 = vrot.lane.b32.xlu0 %v501_v37, %s2875_s15  ;;  %v617_v11 = vsel %vm567_vm2, %v614_v25, %v616_v5  ;;  %v418_v5 = vld [vmem:[%s3099_s13 + $0x110] sm:$0xff] }
 0x140   : > { %v745_v9 = vsel %vm456_vm3, %v742_v48, %v744_v22 }
 0x141   : > { %v3562_v0 = vpop.permute.xlu1 %762  ;;  %v3564_v1 = vpop.permute.xlu0 %698 }
 0x143   : > { %901 = vrot.lane.b32.xlu1 %v3558_v62, %s2879_s29  ;;  %841 = vrot.lane.b32.xlu0 %v612_v38, %s2878_s19 }
 0x145   : > { %v1017_v59 = vpop.permute.xlu1 %1016  ;;  %v954_v2 = vpop.permute.xlu0 %953 }
 0x146   : > { %v1218_v47 = vsel %vm1211_vm12, %v1197_v39, %v1017_v59  ;;  %v1198_v61 = vsel %vm1190_vm11, %v1177_v24, %v954_v2 }
 0x147   : > { %712 = vrot.lane.b32.xlu1 %v3558_v62, %s2876_s16  ;;  %652 = vrot.lane.b32.xlu0 %v612_v38, %s2874_s14  ;;  %v1073_v38 = vsel %vm1064_vm5, %v3231_v28, %v3511_v26 }
 0x148   : > { %2690 = vmatprep.mubr.msk.f32.mxu0 %vm1238_vm13, %v1218_v47  ;;  %v1094_v51 = vsel %vm1085_vm6, %v1073_v38, %v3531_v33  ;;  %v741_v33 = vrot.slane %v414_v52, 1 }
 0x149   : > { %v3624_v10 = vpop.permute.xlu1 %764  ;;  %v3626_v14 = vpop.permute.xlu0 %527  ;;  %v1115_v53 = vsel %vm1106_vm7, %v1094_v51, %v3542_v43 }
 0x14a   : > { %v1136_v35 = vsel %vm1127_vm8, %v1115_v53, %v3562_v0  ;;  %v1074_v0 = vsel %vm1064_vm5, %v3234_v29, %v3533_v34  ;;  %v743_v2 = vsel %vm456_vm3, %v741_v33, %v742_v48  ;;  %v1000_v53 = vrot.slane %v418_v5, 2 }
 0x14b   : > { %967 = vrot.lane.b32.xlu1 %v504_v49, %s2880_s9  ;;  %903 = vrot.lane.b32.xlu0 %v3567_v7, %s2879_s29  ;;  %v1095_v59 = vsel %vm1085_vm6, %v1074_v0, %v3544_v44 }
 0x14c   : > { %v1116_v47 = vsel %vm1106_vm7, %v1095_v59, %v3564_v1 }
 0x14d   : > { %v1019_v27 = vpop.permute.xlu1 %1018  ;;  %v828_v20 = vpop.permute.xlu0 %827  ;;  %v1137_v29 = vsel %vm1127_vm8, %v1116_v47, %v3624_v10 }
 0x14e   : > { %v1219_v3 = vsel %vm1211_vm12, %v1198_v61, %v1019_v27  ;;  %v1157_v28 = vsel %vm1148_vm9, %v1136_v35, %v828_v20  ;;  %v809_v61 = vrot.slane %v416_v16, 2 }
 0x14f   : > { %778 = vrot.lane.b32.xlu1 %v504_v49, %s2877_s17  ;;  %714 = vrot.lane.b32.xlu0 %v3567_v7, %s2876_s16 }
 0x150   : > { %2691 = vmatmul.mubr.msk.f32.gmra.mrb[6].mxu0 %vm1238_vm13, %v1219_v3  ;;  %v810_v3 = vsel %vm567_vm2, %v807_v4, %v809_v61 }
 0x151   : > { %v3650_v31 = vpop.permute.xlu1 %638  ;;  %v3652_v46 = vpop.permute.xlu0 %529 }
 0x153   : > { %1032 = vrot.lane.b32.xlu1 %v615_v30, %s2881_s25  ;;  %969 = vrot.lane.b32.xlu0 %v506_v17, %s2880_s9 }
 0x155   : > { %v890_v36 = vpop.permute.xlu1 %889  ;;  %v830_v32 = vpop.permute.xlu0 %829 }
 0x156   : > { %v1178_v26 = vsel %vm1169_vm10, %v1157_v28, %v890_v36  ;;  %v1158_v34 = vsel %vm1148_vm9, %v1137_v29, %v830_v32  ;;  %v417_v36 = vld [vmem:[%s3099_s13 + $0x108] sm:$0xff]  ;;  %v419_v32 = vld [vmem:[%s3099_s13 + $0x118] sm:$0x3] }
 0x157   : > { %780 = vrot.lane.b32.xlu1 %v506_v17, %s2877_s17  ;;  %543 = vrot.lane.b32.xlu0 %v504_v49, %s2875_s15  ;;  %v806_v49 = vrot.slane %v414_v52, 2  ;;  %v1002_v33 = vrot.slane %v419_v32, 2 }
 0x159   : > { %v3659_v37 = vpop.permute.xlu1 %700  ;;  %v3661_v40 = vpop.permute.xlu0 %640  ;;  %v808_v10 = vsel %vm567_vm2, %v806_v49, %v807_v4 }
 0x15b   : > { %1034 = vrot.lane.b32.xlu1 %v617_v11, %s2881_s25  ;;  %843 = vrot.lane.b32.xlu0 %v615_v30, %s2878_s19 }
 0x15d   : > { %v956_v41 = vpop.permute.xlu1 %955  ;;  %v892_v42 = vpop.permute.xlu0 %891 }
 0x15e   : > { %v1199_v43 = vsel %vm1190_vm11, %v1178_v26, %v956_v41  ;;  %v1179_v44 = vsel %vm1169_vm10, %v1158_v34, %v892_v42  ;;  %v934_v41 = vrot.slane %v417_v36, 1  ;;  %v937_v42 = vrot.slane %v419_v32, 1 }
 0x15f   : > { %654 = vrot.lane.b32.xlu1 %v615_v30, %s2874_s14  ;;  %545 = vrot.lane.b32.xlu0 %v506_v17, %s2875_s15 }
 0x161   : > { %v3675_v54 = vpop.permute.xlu1 %766  ;;  %v3677_v63 = vpop.permute.xlu0 %702 }
 0x163   : > { %905 = vrot.lane.b32.xlu1 %v414_v52, %s2879_s29  ;;  %845 = vrot.lane.b32.xlu0 %v617_v11, %s2878_s19 }
 0x165   : > { %v1021_v55 = vpop.permute.xlu1 %1020  ;;  %v958_v58 = vpop.permute.xlu0 %957 }
 0x166   : > { %v1220_v39 = vsel %vm1211_vm12, %v1199_v43, %v1021_v55  ;;  %v1200_v1 = vsel %vm1190_vm11, %v1179_v44, %v958_v58  ;;  %v1003_v58 = vsel %vm567_vm2, %v1000_v53, %v1002_v33 }
 0x167   : > { %716 = vrot.lane.b32.xlu1 %v414_v52, %s2876_s16  ;;  %656 = vrot.lane.b32.xlu0 %v617_v11, %s2874_s14  ;;  %v935_v11 = vrot.slane %v418_v5, 1  ;;  %v1075_v52 = vsel %vm1064_vm5, %v3266_v45, %v3626_v14 }
 0x168   : > { %2693 = vmatprep.mubr.msk.f32.mxu0 %vm1238_vm13, %v1220_v39  ;;  %v1096_v35 = vsel %vm1085_vm6, %v1075_v52, %v3650_v31 }
 0x169   : > { %v3699_v8 = vpop.permute.xlu1 %768  ;;  %v3701_v56 = vpop.permute.xlu0 %531  ;;  %v938_v28 = vsel %vm456_vm3, %v935_v11, %v937_v42  ;;  %v936_v26 = vsel %vm456_vm3, %v934_v41, %v935_v11  ;;  %v1117_v48 = vsel %vm1106_vm7, %v1096_v35, %v3659_v37 }
 0x16a   : > { %v1138_v45 = vsel %vm1127_vm8, %v1117_v48, %v3675_v54  ;;  %v1076_v54 = vsel %vm1064_vm5, %v3273_v50, %v3652_v46  ;;  %v1077_v61 = vsel %vm1064_vm5, %v3320_v18, %v3701_v56 }
 0x16b   : > { %971 = vrot.lane.b32.xlu1 %v743_v2, %s2880_s9  ;;  %907 = vrot.lane.b32.xlu0 %v415_v15, %s2879_s29  ;;  %v1097_v47 = vsel %vm1085_vm6, %v1076_v54, %v3661_v40 }
 0x16c   : > { %v1118_v16 = vsel %vm1106_vm7, %v1097_v47, %v3677_v63 }
 0x16d   : > { %v1023_v23 = vpop.permute.xlu1 %1022  ;;  %v832_v57 = vpop.permute.xlu0 %831  ;;  %v1139_v44 = vsel %vm1127_vm8, %v1118_v16, %v3699_v8 }
 0x16e   : > { %v1221_v24 = vsel %vm1211_vm12, %v1200_v1, %v1023_v23  ;;  %v1159_v14 = vsel %vm1148_vm9, %v1138_v45, %v832_v57 }
 0x16f   : > { %782 = vrot.lane.b32.xlu1 %v743_v2, %s2877_s17  ;;  %718 = vrot.lane.b32.xlu0 %v415_v15, %s2876_s16  ;;  %v999_v15 = vrot.slane %v417_v36, 2 }
 0x170   : > { %2694 = vmatmul.mubr.msk.f32.gmra.mrb[8].mxu0 %vm1238_vm13, %v1221_v24 }
 0x171   : > { %v3717_v25 = vpop.permute.xlu1 %642  ;;  %v3719_v60 = vpop.permute.xlu0 %533  ;;  %v1001_v39 = vsel %vm567_vm2, %v999_v15, %v1000_v53 }
 0x172   : > { %v1078_v18 = vsel %vm1064_vm5, %v3328_v21, %v3719_v60 }
 0x173   : > { %1036 = vrot.lane.b32.xlu1 %v808_v10, %s2881_s25  ;;  %973 = vrot.lane.b32.xlu0 %v745_v9, %s2880_s9 }
 0x175   : > { %v894_v27 = vpop.permute.xlu1 %893  ;;  %v834_v20 = vpop.permute.xlu0 %833 }
 0x176   : > { %v1180_v31 = vsel %vm1169_vm10, %v1159_v14, %v894_v27  ;;  %v1160_v49 = vsel %vm1148_vm9, %v1139_v44, %v834_v20  ;;  %v1098_v27 = vsel %vm1085_vm6, %v1077_v61, %v3717_v25 }
 0x177   : > { %847 = vrot.lane.b32.xlu1 %v808_v10, %s2878_s19  ;;  %784 = vrot.lane.b32.xlu0 %v745_v9, %s2877_s17 }
 0x179   : > { %v705_v30 = vpop.permute.xlu1 %704  ;;  %v3726_v17 = vpop.permute.xlu0 %644 }
 0x17a   : > { %v1119_v20 = vsel %vm1106_vm7, %v1098_v27, %v705_v30  ;;  %v1099_v56 = vsel %vm1085_vm6, %v1078_v18, %v3726_v17 }
 0x17b   : > { %849 = vrot.lane.b32.xlu1 %v810_v3, %s2878_s19  ;;  %1038 = vrot.lane.b32.xlu0 %v810_v3, %s2881_s25 }
 0x17d   : > { %v960_v38 = vpop.permute.xlu1 %959  ;;  %v896_v51 = vpop.permute.xlu0 %895 }
 0x17e   : > { %v1201_v0 = vsel %vm1190_vm11, %v1180_v31, %v960_v38  ;;  %v1181_v50 = vsel %vm1169_vm10, %v1160_v49, %v896_v51 }
 0x17f   : > { %911 = vrot.lane.b32.xlu1 %v418_v5, %s2879_s29  ;;  %909 = vrot.lane.b32.xlu0 %v417_v36, %s2879_s29 }
 0x181   : > { %v771_v43 = vpop.permute.xlu1 %770  ;;  %v707_v55 = vpop.permute.xlu0 %706 }
 0x182   : > { %v1140_v36 = vsel %vm1127_vm8, %v1119_v20, %v771_v43  ;;  %v1120_v25 = vsel %vm1106_vm7, %v1099_v56, %v707_v55 }
 0x183   : > { %977 = vrot.lane.b32.xlu1 %v938_v28, %s2880_s9  ;;  %975 = vrot.lane.b32.xlu0 %v936_v26, %s2880_s9 }
 0x185   : > { %v1025_v37 = vpop.permute.xlu1 %1024  ;;  %v962_v59 = vpop.permute.xlu0 %961 }
 0x186   : > { %v1222_v2 = vsel %vm1211_vm12, %v1201_v0, %v1025_v37  ;;  %v1202_v46 = vsel %vm1190_vm11, %v1181_v50, %v962_v59 }
 0x187   : > { %1042 = vrot.lane.b32.xlu1 %v1003_v58, %s2881_s25  ;;  %1040 = vrot.lane.b32.xlu0 %v1001_v39, %s2881_s25 }
 0x188   : > { %2696 = vmatprep.mubr.msk.f32.mxu0 %vm1238_vm13, %v1222_v2  ;;  %v3806_v2 = vld [vmem:[%s4502_s2] ss:$0 sm:$0xff] }
 0x189   : > { %v773_v29 = vpop.permute.xlu1 %772  ;;  %v536_v34 = vpop.permute.xlu0 %535 }
 0x18a   : > { %v1141_v53 = vsel %vm1127_vm8, %v1120_v25, %v773_v29  ;;  %v1079_v58 = vsel %vm1064_vm5, %v3396_v12, %v536_v34 }
 0x18d   : > { %v1027_v4 = vpop.permute.xlu1 %1026  ;;  %v836_v22 = vpop.permute.xlu0 %835 }
 0x18e   : > { %v1223_v40 = vsel %vm1211_vm12, %v1202_v46, %v1027_v4  ;;  %v1161_v32 = vsel %vm1148_vm9, %v1140_v36, %v836_v22 }
 0x18f   : > { %2697 = vmatmul.mubr.msk.f32.gmra.mrb[10].mxu0 %vm1238_vm13, %v1223_v40 }
 0x191   : > { %v647_v1 = vpop.permute.xlu1 %646  ;;  %v538_v23 = vpop.permute.xlu0 %537 }
 0x192   : > { %v1100_v39 = vsel %vm1085_vm6, %v1079_v58, %v647_v1  ;;  %v1080_v40 = vsel %vm1064_vm5, %v3405_v19, %v538_v23 }
 0x195   : > { %v898_v63 = vpop.permute.xlu1 %897  ;;  %v838_v57 = vpop.permute.xlu0 %837 }
 0x196   : > { %v1182_v11 = vsel %vm1169_vm10, %v1161_v32, %v898_v63  ;;  %v1162_v15 = vsel %vm1148_vm9, %v1141_v53, %v838_v57 }
 0x199   : > { %v709_v24 = vpop.permute.xlu1 %708  ;;  %v649_v10 = vpop.permute.xlu0 %648 }
 0x19a   : > { %v1121_v0 = vsel %vm1106_vm7, %v1100_v39, %v709_v24  ;;  %v1101_v63 = vsel %vm1085_vm6, %v1080_v40, %v649_v10 }
 0x19d   : > { %v964_v9 = vpop.permute.xlu1 %963  ;;  %v900_v8 = vpop.permute.xlu0 %899 }
 0x19e   : > { %v1203_v41 = vsel %vm1190_vm11, %v1182_v11, %v964_v9  ;;  %v1183_v35 = vsel %vm1169_vm10, %v1162_v15, %v900_v8 }
 0x1a1   : > { %v775_v3 = vpop.permute.xlu1 %774  ;;  %v711_v5 = vpop.permute.xlu0 %710 }
 0x1a2   : > { %v1142_v54 = vsel %vm1127_vm8, %v1121_v0, %v775_v3  ;;  %v1122_v57 = vsel %vm1106_vm7, %v1101_v63, %v711_v5 }
 0x1a5   : > { %v1029_v42 = vpop.permute.xlu1 %1028  ;;  %v966_v38 = vpop.permute.xlu0 %965 }
 0x1a6   : > { %v1224_v51 = vsel %vm1211_vm12, %v1203_v41, %v1029_v42  ;;  %v1204_v28 = vsel %vm1190_vm11, %v1183_v35, %v966_v38 }
 0x1a7   : > { %2699 = vmatprep.mubr.msk.f32.mxu0 %vm1238_vm13, %v1224_v51 }
 0x1a9   : > { %v777_v30 = vpop.permute.xlu1 %776  ;;  %v540_v52 = vpop.permute.xlu0 %539 }
 0x1aa   : > { %v1143_v8 = vsel %vm1127_vm8, %v1122_v57, %v777_v30  ;;  %v1081_v51 = vsel %vm1064_vm5, %v3475_v6, %v540_v52 }
 0x1ad   : > { %v1031_v26 = vpop.permute.xlu1 %1030  ;;  %v840_v33 = vpop.permute.xlu0 %839 }
 0x1ae   : > { %v1225_v21 = vsel %vm1211_vm12, %v1204_v28, %v1031_v26  ;;  %v1163_v47 = vsel %vm1148_vm9, %v1142_v54, %v840_v33 }
 0x1af   : > { %2700 = vmatmul.mubr.msk.f32.gmra.mrb[12].mxu0 %vm1238_vm13, %v1225_v21 }
 0x1b1   : > { %v651_v60 = vpop.permute.xlu1 %650  ;;  %v3795_v17 = vpop.permute.xlu0 %541 }
 0x1b2   : > { %v1102_v18 = vsel %vm1085_vm6, %v1081_v51, %v651_v60 }
 0x1b5   : > { %v902_v48 = vpop.permute.xlu1 %901  ;;  %v842_v43 = vpop.permute.xlu0 %841 }
 0x1b6   : > { %v1184_v29 = vsel %vm1169_vm10, %v1163_v47, %v902_v48  ;;  %v1164_v61 = vsel %vm1148_vm9, %v1143_v8, %v842_v43 }
 0x1b9   : > { %v713_v55 = vpop.permute.xlu1 %712  ;;  %v3797_v45 = vpop.permute.xlu0 %652 }
 0x1ba   : > { %v1123_v56 = vsel %vm1106_vm7, %v1102_v18, %v713_v55  ;;  %v1082_v55 = vsel %vm1064_vm5, %v3484_v13, %v3795_v17 }
 0x1bd   : > { %v968_v14 = vpop.permute.xlu1 %967  ;;  %v904_v31 = vpop.permute.xlu0 %903 }
 0x1be   : > { %v1205_v44 = vsel %vm1190_vm11, %v1184_v29, %v968_v14  ;;  %v1185_v27 = vsel %vm1169_vm10, %v1164_v61, %v904_v31  ;;  %v1103_v31 = vsel %vm1085_vm6, %v1082_v55, %v3797_v45 }
 0x1c1   : > { %v779_v37 = vpop.permute.xlu1 %778  ;;  %v715_v59 = vpop.permute.xlu0 %714 }
 0x1c2   : > { %v1144_v53 = vsel %vm1127_vm8, %v1123_v56, %v779_v37  ;;  %v1124_v58 = vsel %vm1106_vm7, %v1103_v31, %v715_v59 }
 0x1c3   : > { %v2683_v16 = vpop.f32.mrb[0].mxu0 }
 0x1c4   : > { %v1375_v12 = vadd.f32 %v2683_v16, %v3806_v2  ;;  %v1369_v34 = vpop.f32.mrb[1].mxu0 }
 0x1c5   : > { %v1370_v49 = vadd.f32 %v3806_v2, %v1369_v34  ;;  %v1033_v50 = vpop.permute.xlu1 %1032  ;;  %v970_v46 = vpop.permute.xlu0 %969 }
 0x1c6   : > { %v1469_v4 = vmax.f32 %v1375_v12, 0.0  ;;  %v1226_v22 = vsel %vm1211_vm12, %v1205_v44, %v1033_v50  ;;  %v1206_v19 = vsel %vm1190_vm11, %v1185_v27, %v970_v46 }
 0x1c7   : > { %v1468_v1 = vmax.f32 %v1370_v49, 0.0  ;;  %2702 = vmatprep.mubr.msk.f32.mxu0 %vm1238_vm13, %v1226_v22 }
 0x1c8   : > { %1520 = vst.msk [vmem:[#allocation3 + $0x9] sm:$0xff] %vm1085_vm6, %v1469_v4 }
 0x1c9   : > { %1519 = vst.msk [vmem:[#allocation3 + $0x1] sm:$0xff] %vm1085_vm6, %v1468_v1  ;;  %v781_v24 = vpop.permute.xlu1 %780  ;;  %v544_v9 = vpop.permute.xlu0 %543 }
 0x1ca   : > { %v1145_v37 = vsel %vm1127_vm8, %v1124_v58, %v781_v24  ;;  %v1083_v12 = vsel %vm1064_vm5, %v3558_v62, %v544_v9 }
 0x1cd   : > { %v1035_v23 = vpop.permute.xlu1 %1034  ;;  %v844_v20 = vpop.permute.xlu0 %843 }
 0x1ce   : > { %v1227_v10 = vsel %vm1211_vm12, %v1206_v19, %v1035_v23  ;;  %v1165_v15 = vsel %vm1148_vm9, %v1144_v53, %v844_v20 }
 0x1cf   : > { %2703 = vmatmul.mubr.msk.f32.gmra.mrb[14].mxu0 %vm1238_vm13, %v1227_v10 }
 0x1d1   : > { %v655_v3 = vpop.permute.xlu1 %654  ;;  %v546_v5 = vpop.permute.xlu0 %545 }
 0x1d2   : > { %v1084_v34 = vsel %vm1064_vm5, %v3567_v7, %v546_v5  ;;  %v1104_v44 = vsel %vm1085_vm6, %v1083_v12, %v655_v3 }
 0x1d5   : > { %v906_v36 = vpop.permute.xlu1 %905  ;;  %v846_v32 = vpop.permute.xlu0 %845 }
 0x1d6   : > { %v1186_v28 = vsel %vm1169_vm10, %v1165_v15, %v906_v36  ;;  %v1166_v54 = vsel %vm1148_vm9, %v1145_v37, %v846_v32 }
 0x1d9   : > { %v717_v11 = vpop.permute.xlu1 %716  ;;  %v657_v41 = vpop.permute.xlu0 %656 }
 0x1da   : > { %v1105_v49 = vsel %vm1085_vm6, %v1084_v34, %v657_v41  ;;  %v1125_v50 = vsel %vm1106_vm7, %v1104_v44, %v717_v11 }
 0x1dd   : > { %v972_v42 = vpop.permute.xlu1 %971  ;;  %v908_v38 = vpop.permute.xlu0 %907 }
 0x1de   : > { %v1207_v21 = vsel %vm1190_vm11, %v1186_v28, %v972_v42  ;;  %v1187_v13 = vsel %vm1169_vm10, %v1166_v54, %v908_v38 }
 0x1e1   : > { %v783_v25 = vpop.permute.xlu1 %782  ;;  %v719_v30 = vpop.permute.xlu0 %718 }
 0x1e2   : > { %v1126_v46 = vsel %vm1106_vm7, %v1105_v49, %v719_v30  ;;  %v1146_v40 = vsel %vm1127_vm8, %v1125_v50, %v783_v25 }
 0x1e3   : > { %v2686_v35 = vpop.f32.mrb[2].mxu0 }
 0x1e4   : > { %v1385_v26 = vadd.f32 %v2686_v35, %v3806_v2  ;;  %v1379_v33 = vpop.f32.mrb[3].mxu0 }
 0x1e5   : > { %v1380_v6 = vadd.f32 %v3806_v2, %v1379_v33  ;;  %v1037_v52 = vpop.permute.xlu1 %1036  ;;  %v974_v60 = vpop.permute.xlu0 %973 }
 0x1e6   : > { %v1471_v48 = vmax.f32 %v1385_v26, 0.0  ;;  %v1228_v43 = vsel %vm1211_vm12, %v1207_v21, %v1037_v52  ;;  %v1208_v17 = vsel %vm1190_vm11, %v1187_v13, %v974_v60 }
 0x1e7   : > { %v1470_v14 = vmax.f32 %v1380_v6, 0.0  ;;  %2705 = vmatprep.mubr.msk.f32.mxu0 %vm1238_vm13, %v1228_v43 }
 0x1e8   : > { %1522 = vst.msk [vmem:[#allocation3 + $0x21] sm:$0xff] %vm1085_vm6, %v1471_v48 }
 0x1e9   : > { %1521 = vst.msk [vmem:[#allocation3 + $0x19] sm:$0xff] %vm1085_vm6, %v1470_v14  ;;  %v848_v39 = vpop.permute.xlu1 %847  ;;  %v785_v0 = vpop.permute.xlu0 %784 }
 0x1ea   : > { %v1147_v1 = vsel %vm1127_vm8, %v1126_v46, %v785_v0  ;;  %v1167_v63 = vsel %vm1148_vm9, %v1146_v40, %v848_v39  ;;  %v2883_v46 = vmov (!%p2574_p7), 0.0  }
 0x1eb   : > { %1542 = vst.msk [vmem:[#allocation3] sm:$0xff] (!%p2574_p7), %vm1085_vm6, %v2883_v46  ;;  %1543 = vst.msk [vmem:[#allocation3 + $0x8] sm:$0xff] (!%p2574_p7), %vm1085_vm6, %v2883_v46 }
 0x1ec   : > { %1544 = vst.msk [vmem:[#allocation3 + $0x10] sm:$0x3] (!%p2574_p7), %vm1490_vm14, %v2883_v46 }
 0x1ed   : > { %v850_v47 = vpop.permute.xlu1 %849  ;;  %v1039_v16 = vpop.permute.xlu0 %1038 }
 0x1ee   : > { %v1229_v45 = vsel %vm1211_vm12, %v1208_v17, %v1039_v16  ;;  %v1168_v62 = vsel %vm1148_vm9, %v1147_v1, %v850_v47 }
 0x1ef   : > { %2706 = vmatmul.mubr.msk.f32.gmra.mrb[16].mxu0 %vm1238_vm13, %v1229_v45 }
 0x1f1   : > { %v912_v29 = vpop.permute.xlu1 %911  ;;  %v910_v59 = vpop.permute.xlu0 %909 }
 0x1f2   : > { %v1189_v7 = vsel %vm1169_vm10, %v1168_v62, %v912_v29  ;;  %v1188_v57 = vsel %vm1169_vm10, %v1167_v63, %v910_v59 }
 0x1f5   : > { %v978_v4 = vpop.permute.xlu1 %977  ;;  %v976_v22 = vpop.permute.xlu0 %975 }
 0x1f6   : > { %v1210_v24 = vsel %vm1190_vm11, %v1189_v7, %v978_v4  ;;  %v1209_v9 = vsel %vm1190_vm11, %v1188_v57, %v976_v22 }
 0x1f9   : > { %v1043_v8 = vpop.permute.xlu1 %1042  ;;  %v1041_v61 = vpop.permute.xlu0 %1040 }
 0x1fa   : > { %v1231_v27 = vsel %vm1211_vm12, %v1210_v24, %v1043_v8  ;;  %v1230_v19 = vsel %vm1211_vm12, %v1209_v9, %v1041_v61 }
 0x1fb   : > { %2708 = vmatprep.mubr.msk.f32.mxu0 %vm1238_vm13, %v1230_v19 }
 0x1fc   : > { %2709 = vmatmul.mubr.msk.f32.gmra.mrb[18].mxu0 %vm1238_vm13, %v1231_v27 }
 0x203   : > { %v2689_v23 = vpop.f32.mrb[4].mxu0 }
 0x204   : > { %v1395_v20 = vadd.f32 %v2689_v23, %v3806_v2  ;;  %v1389_v10 = vpop.f32.mrb[5].mxu0 }
 0x205   : > { %v1390_v3 = vadd.f32 %v3806_v2, %v1389_v10 }
 0x206   : > { %v1473_v5 = vmax.f32 %v1395_v20, 0.0 }
 0x207   : > { %v1472_v36 = vmax.f32 %v1390_v3, 0.0 }
 0x208   : > { %1524 = vst.msk [vmem:[#allocation3 + $0x39] sm:$0xff] %vm1085_vm6, %v1473_v5 }
 0x209   : > { %1523 = vst.msk [vmem:[#allocation3 + $0x31] sm:$0xff] %vm1085_vm6, %v1472_v36 }
 0x223   : > { %v2692_v32 = vpop.f32.mrb[6].mxu0 }
 0x224   : > { %v1405_v11 = vadd.f32 %v2692_v32, %v3806_v2  ;;  %v1399_v41 = vpop.f32.mrb[7].mxu0 }
 0x225   : > { %v1400_v42 = vadd.f32 %v3806_v2, %v1399_v41 }
 0x226   : > { %v1475_v38 = vmax.f32 %v1405_v11, 0.0 }
 0x227   : > { %v1474_v51 = vmax.f32 %v1400_v42, 0.0 }
 0x228   : > { %1526 = vst.msk [vmem:[#allocation3 + $0x51] sm:$0xff] %vm1085_vm6, %v1475_v38 }
 0x229   : > { %1525 = vst.msk [vmem:[#allocation3 + $0x49] sm:$0xff] %vm1085_vm6, %v1474_v51 }
 0x243   : > { %v2695_v18 = vpop.f32.mrb[8].mxu0 }
 0x244   : > { %v1415_v56 = vadd.f32 %v2695_v18, %v3806_v2  ;;  %v1409_v25 = vpop.f32.mrb[9].mxu0 }
 0x245   : > { %v1410_v30 = vadd.f32 %v3806_v2, %v1409_v25 }
 0x246   : > { %v1477_v53 = vmax.f32 %v1415_v56, 0.0 }
 0x247   : > { %v1476_v15 = vmax.f32 %v1410_v30, 0.0 }
 0x248   : > { %1528 = vst.msk [vmem:[#allocation3 + $0x69] sm:$0xff] %vm1085_vm6, %v1477_v53 }
 0x249   : > { %1527 = vst.msk [vmem:[#allocation3 + $0x61] sm:$0xff] %vm1085_vm6, %v1476_v15 }
 0x262   : > { %v2698_v35 = vpop.f32.mrb[10].mxu0 }
 0x263   : > { %v1425_v28 = vadd.f32 %v2698_v35, %v3806_v2  ;;  %v1419_v26 = vpop.f32.mrb[11].mxu0 }
 0x264   : > { %v1420_v33 = vadd.f32 %v3806_v2, %v1419_v26 }
 0x265   : > { %v1479_v21 = vmax.f32 %v1425_v28, 0.0 }
 0x266   : > { %v1478_v6 = vmax.f32 %v1420_v33, 0.0 }
 0x267   : > { %1530 = vst.msk [vmem:[#allocation3 + $0x81] sm:$0xff] %vm1085_vm6, %v1479_v21 }
 0x268   : > { %1529 = vst.msk [vmem:[#allocation3 + $0x79] sm:$0xff] %vm1085_vm6, %v1478_v6 }
 0x282   : > { %v2701_v52 = vpop.f32.mrb[12].mxu0 }
 0x283   : > { %v1435_v60 = vadd.f32 %v2701_v52, %v3806_v2  ;;  %v1429_v48 = vpop.f32.mrb[13].mxu0 }
 0x284   : > { %v1430_v43 = vadd.f32 %v3806_v2, %v1429_v48 }
 0x285   : > { %v1481_v55 = vmax.f32 %v1435_v60, 0.0 }
 0x286   : > { %v1480_v14 = vmax.f32 %v1430_v43, 0.0 }
 0x287   : > { %1532 = vst.msk [vmem:[#allocation3 + $0x99] sm:$0xff] %vm1085_vm6, %v1481_v55 }
 0x288   : > { %1531 = vst.msk [vmem:[#allocation3 + $0x91] sm:$0xff] %vm1085_vm6, %v1480_v14 }
 0x2a2   : > { %v2704_v31 = vpop.f32.mrb[14].mxu0 }
 0x2a3   : > { %v1445_v58 = vadd.f32 %v2704_v31, %v3806_v2  ;;  %v1439_v39 = vpop.f32.mrb[15].mxu0 }
 0x2a4   : > { %v1440_v0 = vadd.f32 %v3806_v2, %v1439_v39 }
 0x2a5   : > { %v1483_v37 = vmax.f32 %v1445_v58, 0.0 }
 0x2a6   : > { %v1482_v54 = vmax.f32 %v1440_v0, 0.0 }
 0x2a7   : > { %1534 = vst.msk [vmem:[#allocation3 + $0xb1] sm:$0xff] %vm1085_vm6, %v1483_v37 }
 0x2a8   : > { %1533 = vst.msk [vmem:[#allocation3 + $0xa9] sm:$0xff] %vm1085_vm6, %v1482_v54 }
 0x2c2   : > { %v2707_v13 = vpop.f32.mrb[16].mxu0 }
 0x2c3   : > { %v1455_v17 = vadd.f32 %v2707_v13, %v3806_v2  ;;  %v1449_v47 = vpop.f32.mrb[17].mxu0 }
 0x2c4   : > { %v1450_v16 = vadd.f32 %v3806_v2, %v1449_v47 }
 0x2c5   : > { %v1485_v45 = vmax.f32 %v1455_v17, 0.0 }
 0x2c6   : > { %v1484_v29 = vmax.f32 %v1450_v16, 0.0 }
 0x2c7   : > { %1536 = vst.msk [vmem:[#allocation3 + $0xc9] sm:$0xff] %vm1085_vm6, %v1485_v45 }
 0x2c8   : > { %1535 = vst.msk [vmem:[#allocation3 + $0xc1] sm:$0xff] %vm1085_vm6, %v1484_v29 }
 0x2cf   : > { %v2710_v59 = vpop.f32.mrb[18].mxu0  ;;  %1541 = sbr.rel (%p2574_p7) target bundleno = 726 (0x2d6), region = 48 }
 0x2d0   : > { %v1465_v12 = vadd.f32 %v2710_v59, %v3806_v2  ;;  %v1459_v34 = vpop.f32.mrb[19].mxu0 }
 0x2d1   : > { %v1460_v44 = vadd.f32 %v3806_v2, %v1459_v34 }
 0x2d2   : > { %v1487_v49 = vmax.f32 %v1465_v12, 0.0 }
 0x2d3   : > { %v1486_v50 = vmax.f32 %v1460_v44, 0.0 }
 0x2d4   : > { %1538 = vst.msk [vmem:[#allocation3 + $0xe1] sm:$0xff] %vm1085_vm6, %v1487_v49 }
 0x2d5   : > { %1537 = vst.msk [vmem:[#allocation3 + $0xd9] sm:$0xff] %vm1085_vm6, %v1486_v50 }
 0x2d6 PF: > { %p2600_p8 = scmp.ne.s32.totalorder %s2855_s18, 1 }
 0x2d7   : > { %v2884_v2 = vmov (!%p2600_p8), 0.0  }
 0x2d8   : > { %1548 = sbr.rel (%p2600_p8) target bundleno = 735 (0x2df), region = 52  ;;  %1550 = vst.msk [vmem:[#allocation3 + $0xd8] sm:$0xff] (!%p2600_p8), %vm1085_vm6, %v2884_v2  ;;  %1551 = vst.msk [vmem:[#allocation3 + $0xe0] sm:$0xff] (!%p2600_p8), %vm1085_vm6, %v2884_v2 }
 0x2d9   : > { %1552 = vst.msk [vmem:[#allocation3 + $0xe8] sm:$0x3] (!%p2600_p8), %vm1490_vm14, %v2884_v2 }
 0x2df PF: > { %v3915_v4 = vld [vmem:[#allocation3] sm:$0xff]  ;;  %v3917_v22 = vld [vmem:[#allocation3 + $0x8] sm:$0xff]  ;;  %v1555_v40 = vld [vmem:[#allocation3 + $0x10] sm:$0x3]  ;;  %s2885_s27 = smov 40   ;;  %s2886_s13 = smov 48  }
 0x2e0   : > { %v1705_v1 = vrot.slane %v3915_v4, 2  ;;  %v1706_v63 = vrot.slane %v3917_v22, 2  ;;  %v1617_v62 = vrot.slane %v3915_v4, 1  ;;  %v1618_v7 = vrot.slane %v3917_v22, 1  ;;  %v3929_v19 = vld [vmem:[#allocation3 + $0x20] sm:$0xff]  ;;  %v3931_v23 = vld [vmem:[#allocation3 + $0x18] sm:$0xff] }
 0x2e1   : > { %v1708_v57 = vrot.slane %v1555_v40, 2  ;;  %v1620_v24 = vrot.slane %v1555_v40, 1  ;;  %v1622_v20 = vrot.slane %v3931_v23, 1  ;;  %v1623_v10 = vrot.slane %v3929_v19, 1  ;;  %v1558_v3 = vld [vmem:[#allocation3 + $0x28] sm:$0x3] }
 0x2e2   : > { %v1707_v9 = vsel %vm567_vm2, %v1705_v1, %v1706_v63  ;;  %v1619_v8 = vsel %vm456_vm3, %v1617_v62, %v1618_v7  ;;  %v1710_v36 = vrot.slane %v3931_v23, 2  ;;  %v1711_v32 = vrot.slane %v3929_v19, 2  ;;  %v1583_v38 = vld [vmem:[%s4503_s3] sm:$0xff]  ;;  %v1584_v51 = vld [vmem:[%s4503_s3 + $0x8] sm:$0xff]  ;;  %v1585_v25 = vld [vmem:[%s4503_s3 + $0x10] sm:$0xff]  ;;  %s2887_s26 = smov 56  }
 0x2e3   : > { %1745 = vrot.lane.b32.xlu1 %v1707_v9, %s2877_s17  ;;  %1657 = vrot.lane.b32.xlu0 %v1619_v8, %s2874_s14  ;;  %v1709_v61 = vsel %vm567_vm2, %v1706_v63, %v1708_v57  ;;  %v1621_v27 = vsel %vm456_vm3, %v1618_v7, %v1620_v24  ;;  %v1624_v5 = vsel %vm456_vm3, %v1622_v20, %v1623_v10  ;;  %v1625_v11 = vrot.slane %v1558_v3, 1  ;;  %v1586_v30 = vld [vmem:[%s4503_s3 + $0x18] sm:$0xff]  ;;  %v3964_v15 = vld [vmem:[#allocation3 + $0x30] sm:$0xff]  ;;  %v1587_v26 = vld [vmem:[%s4503_s3 + $0x20] sm:$0xff]  ;;  %s2888_s6 = smov 64  }
 0x2e4   : > { %v1712_v41 = vsel %vm567_vm2, %v1710_v36, %v1711_v32  ;;  %v2761_v18 = vpack.c.bf16 %v1584_v51, %v1583_v38  ;;  %v1713_v56 = vrot.slane %v1558_v3, 2  ;;  %v2765_v53 = vpack.c.bf16 %v1586_v30, %v1585_v25  ;;  %v3967_v28 = vld [vmem:[#allocation3 + $0x38] sm:$0xff]  ;;  %v1588_v33 = vld [vmem:[%s4503_s3 + $0x28] sm:$0xff]  ;;  %v1589_v60 = vld [vmem:[%s4503_s3 + $0x30] sm:$0xff] }
 0x2e5   : > { %v1626_v42 = vsel %vm456_vm3, %v1623_v10, %v1625_v11  ;;  %v2769_v21 = vpack.c.bf16 %v1588_v33, %v1587_v26  ;;  %v1627_v6 = vrot.slane %v3964_v15, 1  ;;  %v1628_v52 = vrot.slane %v3967_v28, 1  ;;  %v1590_v48 = vld [vmem:[%s4503_s3 + $0x38] sm:$0xff]  ;;  %v1561_v14 = vld [vmem:[#allocation3 + $0x40] sm:$0x3]  ;;  %v4012_v47 = vld [vmem:[#allocation3 + $0x48] sm:$0xff] }
 0x2e6   : > { %2762 = vmatprep.subr.bf16.mxu1 %v2761_v18  ;;  %v1714_v35 = vsel %vm567_vm2, %v1711_v32, %v1713_v56  ;;  %v2773_v55 = vpack.c.bf16 %v1590_v48, %v1589_v60  ;;  %v1591_v31 = vld [vmem:[%s4503_s3 + $0x40] sm:$0xff]  ;;  %v1715_v58 = vrot.slane %v3964_v15, 2  ;;  %v1716_v39 = vrot.slane %v3967_v28, 2  ;;  %v4014_v16 = vld [vmem:[#allocation3 + $0x50] sm:$0xff]  ;;  %v1564_v12 = vld [vmem:[#allocation3 + $0x58] sm:$0x3] }
 0x2e7   : > { %1747 = vrot.lane.b32.xlu1 %v1709_v61, %s2877_s17  ;;  %1659 = vrot.lane.b32.xlu0 %v1621_v27, %s2874_s14  ;;  %v1629_v43 = vsel %vm456_vm3, %v1627_v6, %v1628_v52  ;;  %v1630_v0 = vrot.slane %v1561_v14, 1  ;;  %v1718_v13 = vrot.slane %v1561_v14, 2  ;;  %v1632_v45 = vrot.slane %v4012_v47, 1  ;;  %v4044_v1 = vld [vmem:[#allocation3 + $0x60] sm:$0xff]  ;;  %v4046_v63 = vld [vmem:[#allocation3 + $0x68] sm:$0xff]  ;;  %v4076_v32 = vld [vmem:[#allocation3 + $0x78] sm:$0xff] }
 0x2e8   : > { %2764 = vmatpush3.bf16.msra.mxu1 %v2761_v18  ;;  %v1717_v37 = vsel %vm567_vm2, %v1715_v58, %v1716_v39  ;;  %v1633_v29 = vrot.slane %v4014_v16, 1  ;;  %v1720_v34 = vrot.slane %v4012_v47, 2  ;;  %v1721_v44 = vrot.slane %v4014_v16, 2  ;;  %v1567_v24 = vld [vmem:[#allocation3 + $0x70] sm:$0x3] }
 0x2e9   : > { %2766 = vmatprep.subr.bf16.mxu1 %v2765_v53  ;;  %v1631_v54 = vsel %vm456_vm3, %v1628_v52, %v1630_v0  ;;  %v1719_v17 = vsel %vm567_vm2, %v1716_v39, %v1718_v13  ;;  %v1635_v49 = vrot.slane %v1564_v12, 1  ;;  %v1723_v2 = vrot.slane %v1564_v12, 2 }
 0x2ea   : > { %v1634_v59 = vsel %vm456_vm3, %v1632_v45, %v1633_v29  ;;  %v1722_v50 = vsel %vm567_vm2, %v1720_v34, %v1721_v44  ;;  %v1637_v62 = vrot.slane %v4044_v1, 1  ;;  %v1638_v7 = vrot.slane %v4046_v63, 1 }
 0x2eb   : > { %1797 = vrot.lane.b32.xlu1 %v3929_v19, %s2879_s29  ;;  %1795 = vrot.lane.b32.xlu0 %v3931_v23, %s2879_s29  ;;  %v1636_v46 = vsel %vm456_vm3, %v1633_v29, %v1635_v49  ;;  %v1724_v40 = vsel %vm567_vm2, %v1721_v44, %v1723_v2  ;;  %v1725_v9 = vrot.slane %v4044_v1, 2  ;;  %v1726_v8 = vrot.slane %v4046_v63, 2  ;;  %v4125_v29 = vld [vmem:[#allocation3 + $0x90] sm:$0xff]  ;;  %v4132_v44 = vld [vmem:[#allocation3 + $0x98] sm:$0xff] }
 0x2ec   : > { %2768 = vmatpush3.bf16.msra.mxu1 %v2765_v53  ;;  %v1639_v57 = vsel %vm456_vm3, %v1637_v62, %v1638_v7  ;;  %v1640_v61 = vrot.slane %v1567_v24, 1  ;;  %v1728_v10 = vrot.slane %v1567_v24, 2  ;;  %v1642_v38 = vrot.slane %v4076_v32, 1 }
 0x2ed   : > { %2770 = vmatprep.subr.bf16.mxu1 %v2769_v21  ;;  %v1727_v27 = vsel %vm567_vm2, %v1725_v9, %v1726_v8  ;;  %v1730_v26 = vrot.slane %v4076_v32, 2  ;;  %vm2171_vm15 = vcmask 326656   ;;  %vm2188_vm0 = vcmask 392192  }
 0x2ee   : > { %v1641_v20 = vsel %vm456_vm3, %v1638_v7, %v1640_v61  ;;  %v1729_v3 = vsel %vm567_vm2, %v1726_v8, %v1728_v10  ;;  %vm2205_vm1 = vcmask 457728   ;;  %vm2222_vm4 = vcmask 523264  }
 0x2ef   : > { %1661 = vrot.lane.b32.xlu1 %v1624_v5, %s2874_s14  ;;  %1849 = vrot.lane.b32.xlu0 %v1624_v5, %s2881_s25  ;;  %v1648_v2 = vrot.slane %v4132_v44, 1  ;;  %vm2245_vm5 = vcmask 588800  }
 0x2f0   : > { %2772 = vmatpush3.bf16.msra.mxu1 %v2769_v21 }
 0x2f1   : > { %2774 = vmatprep.subr.bf16.mxu1 %v2773_v55 }
 0x2f3   : > { %1902 = vrot.lane.b32.xlu1 %v1712_v41, %s2885_s27  ;;  %1851 = vrot.lane.b32.xlu0 %v1626_v42, %s2881_s25 }
 0x2f4   : > { %2776 = vmatpush3.bf16.msra.mxu1 %v2773_v55 }
 0x2f5   : > { %2727 = vmatprep.subr.mxu1 %v1591_v31 }
 0x2f7   : > { %1749 = vrot.lane.b32.xlu1 %v1712_v41, %s2877_s17  ;;  %1663 = vrot.lane.b32.xlu0 %v1626_v42, %s2874_s14  ;;  %v4080_v42 = vld [vmem:[#allocation3 + $0x80] sm:$0xff] }
 0x2f8   : > { %2728 = vmatpush3.msra.mxu1 %v1591_v31  ;;  %v1643_v51 = vrot.slane %v4080_v42, 1  ;;  %v1731_v33 = vrot.slane %v4080_v42, 2 }
 0x2fa   : > { %v1644_v25 = vsel %vm456_vm3, %v1642_v38, %v1643_v51  ;;  %v1732_v60 = vsel %vm567_vm2, %v1730_v26, %v1731_v33 }
 0x2fb   : > { %1952 = vrot.lane.b32.xlu1 %v3964_v15, %s2886_s13  ;;  %1904 = vrot.lane.b32.xlu0 %v1714_v35, %s2885_s27 }
 0x2ff   : > { %1799 = vrot.lane.b32.xlu1 %v3964_v15, %s2879_s29  ;;  %1751 = vrot.lane.b32.xlu0 %v1714_v35, %s2877_s17  ;;  %v1570_v35 = vld [vmem:[#allocation3 + $0x88] sm:$0x3] }
 0x300   : > { %v1645_v21 = vrot.slane %v1570_v35, 1  ;;  %v1733_v14 = vrot.slane %v1570_v35, 2 }
 0x302   : > { %v1646_v48 = vsel %vm456_vm3, %v1643_v51, %v1645_v21  ;;  %v1734_v39 = vsel %vm567_vm2, %v1731_v33, %v1733_v14 }
 0x303   : > { %2006 = vrot.lane.b32.xlu1 %v1629_v43, %s2887_s26  ;;  %1954 = vrot.lane.b32.xlu0 %v3967_v28, %s2886_s13 }
 0x307   : > { %1853 = vrot.lane.b32.xlu1 %v1629_v43, %s2881_s25  ;;  %1801 = vrot.lane.b32.xlu0 %v3967_v28, %s2879_s29 }
 0x30b   : > { %2059 = vrot.lane.b32.xlu1 %v1717_v37, %s2888_s6  ;;  %2008 = vrot.lane.b32.xlu0 %v1631_v54, %s2887_s26 }
 0x30f   : > { %1855 = vrot.lane.b32.xlu1 %v1631_v54, %s2881_s25  ;;  %1665 = vrot.lane.b32.xlu0 %v1629_v43, %s2874_s14 }
 0x313   : > { %2061 = vrot.lane.b32.xlu1 %v1719_v17, %s2888_s6  ;;  %1906 = vrot.lane.b32.xlu0 %v1717_v37, %s2885_s27 }
 0x317   : > { %1753 = vrot.lane.b32.xlu1 %v1717_v37, %s2877_s17  ;;  %1667 = vrot.lane.b32.xlu0 %v1631_v54, %s2874_s14 }
 0x31b   : > { %1956 = vrot.lane.b32.xlu1 %v4012_v47, %s2886_s13  ;;  %1908 = vrot.lane.b32.xlu0 %v1719_v17, %s2885_s27 }
 0x31f   : > { %1803 = vrot.lane.b32.xlu1 %v4012_v47, %s2879_s29  ;;  %1755 = vrot.lane.b32.xlu0 %v1719_v17, %s2877_s17 }
 0x323   : > { %2010 = vrot.lane.b32.xlu1 %v1634_v59, %s2887_s26  ;;  %1958 = vrot.lane.b32.xlu0 %v4014_v16, %s2886_s13 }
 0x327   : > { %1857 = vrot.lane.b32.xlu1 %v1634_v59, %s2881_s25  ;;  %1805 = vrot.lane.b32.xlu0 %v4014_v16, %s2879_s29 }
 0x32b   : > { %2063 = vrot.lane.b32.xlu1 %v1722_v50, %s2888_s6  ;;  %2012 = vrot.lane.b32.xlu0 %v1636_v46, %s2887_s26 }
 0x32f   : > { %1859 = vrot.lane.b32.xlu1 %v1636_v46, %s2881_s25  ;;  %1669 = vrot.lane.b32.xlu0 %v1634_v59, %s2874_s14 }
 0x333   : > { %2065 = vrot.lane.b32.xlu1 %v1724_v40, %s2888_s6  ;;  %1910 = vrot.lane.b32.xlu0 %v1722_v50, %s2885_s27 }
 0x337   : > { %1757 = vrot.lane.b32.xlu1 %v1722_v50, %s2877_s17  ;;  %1671 = vrot.lane.b32.xlu0 %v1636_v46, %s2874_s14  ;;  %v1647_v46 = vrot.slane %v4125_v29, 1 }
 0x339   : > { %v1649_v8 = vsel %vm456_vm3, %v1647_v46, %v1648_v2 }
 0x33b   : > { %1960 = vrot.lane.b32.xlu1 %v4044_v1, %s2886_s13  ;;  %1912 = vrot.lane.b32.xlu0 %v1724_v40, %s2885_s27 }
 0x33f   : > { %1807 = vrot.lane.b32.xlu1 %v4044_v1, %s2879_s29  ;;  %1759 = vrot.lane.b32.xlu0 %v1724_v40, %s2877_s17 }
 0x343   : > { %2014 = vrot.lane.b32.xlu1 %v1639_v57, %s2887_s26  ;;  %1962 = vrot.lane.b32.xlu0 %v4046_v63, %s2886_s13 }
 0x347   : > { %1861 = vrot.lane.b32.xlu1 %v1639_v57, %s2881_s25  ;;  %1809 = vrot.lane.b32.xlu0 %v4046_v63, %s2879_s29 }
 0x34b   : > { %2067 = vrot.lane.b32.xlu1 %v1727_v27, %s2888_s6  ;;  %2016 = vrot.lane.b32.xlu0 %v1641_v20, %s2887_s26 }
 0x34f   : > { %1863 = vrot.lane.b32.xlu1 %v1641_v20, %s2881_s25  ;;  %1673 = vrot.lane.b32.xlu0 %v1639_v57, %s2874_s14 }
 0x353   : > { %2069 = vrot.lane.b32.xlu1 %v1729_v3, %s2888_s6  ;;  %1914 = vrot.lane.b32.xlu0 %v1727_v27, %s2885_s27 }
 0x355   : > { %v1746_v5 = vpop.permute.xlu1 %1745  ;;  %v1658_v36 = vpop.permute.xlu0 %1657 }
 0x356   : > { %v2107_v54 = vsel %vm1085_vm6, %v3915_v4, %v1658_v36  ;;  %v1735_v36 = vrot.slane %v4125_v29, 2 }
 0x357   : > { %1761 = vrot.lane.b32.xlu1 %v1727_v27, %s2877_s17  ;;  %1675 = vrot.lane.b32.xlu0 %v1641_v20, %s2874_s14  ;;  %v2123_v45 = vsel %vm1127_vm8, %v2107_v54, %v1746_v5  ;;  %v1573_v20 = vld [vmem:[#allocation3 + $0xa0] sm:$0x3]  ;;  %v4197_v54 = vld [vmem:[#allocation3 + $0xa8] sm:$0xff] }
 0x358   : > { %v1738_v33 = vrot.slane %v1573_v20, 2 }
 0x359   : > { %v4078_v11 = vpop.permute.xlu1 %1747  ;;  %v1660_v41 = vpop.permute.xlu0 %1659 }
 0x35a   : > { %v2108_v40 = vsel %vm1085_vm6, %v3917_v22, %v1660_v41  ;;  %v1650_v41 = vrot.slane %v1573_v20, 1 }
 0x35b   : > { %1964 = vrot.lane.b32.xlu1 %v4076_v32, %s2886_s13  ;;  %1916 = vrot.lane.b32.xlu0 %v1729_v3, %s2885_s27  ;;  %v2124_v9 = vsel %vm1127_vm8, %v2108_v40, %v4078_v11  ;;  %v1736_v11 = vrot.slane %v4132_v44, 2 }
 0x35d   : > { %v4087_v18 = vpop.permute.xlu1 %1797  ;;  %v1796_v56 = vpop.permute.xlu0 %1795 }
 0x35e   : > { %v2139_v59 = vsel %vm1169_vm10, %v2123_v45, %v1796_v56  ;;  %v2140_v22 = vsel %vm1169_vm10, %v2124_v9, %v4087_v18 }
 0x35f   : > { %1811 = vrot.lane.b32.xlu1 %v4076_v32, %s2879_s29  ;;  %1763 = vrot.lane.b32.xlu0 %v1729_v3, %s2877_s17 }
 0x361   : > { %v4093_v30 = vpop.permute.xlu1 %1661  ;;  %v1850_v53 = vpop.permute.xlu0 %1849 }
 0x362   : > { %v2155_v4 = vsel %vm1211_vm12, %v2139_v59, %v1850_v53  ;;  %v1651_v53 = vsel %vm456_vm3, %v1648_v2, %v1650_v41  ;;  %v4205_v59 = vld [vmem:[#allocation3 + $0xb0] sm:$0xff] }
 0x363   : > { %2018 = vrot.lane.b32.xlu1 %v1644_v25, %s2887_s26  ;;  %1966 = vrot.lane.b32.xlu0 %v4080_v42, %s2886_s13 }
 0x365   : > { %v1903_v6 = vpop.permute.xlu1 %1902  ;;  %v1852_v52 = vpop.permute.xlu0 %1851 }
 0x366   : > { %v2172_v49 = vsel %vm2171_vm15, %v2155_v4, %v1903_v6  ;;  %v2156_v10 = vsel %vm1211_vm12, %v2140_v22, %v1852_v52  ;;  %v1739_v52 = vsel %vm567_vm2, %v1736_v11, %v1738_v33  ;;  %v1653_v4 = vrot.slane %v4205_v59, 1 }
 0x367   : > { %1865 = vrot.lane.b32.xlu1 %v1644_v25, %s2881_s25  ;;  %1813 = vrot.lane.b32.xlu0 %v4080_v42, %s2879_s29 }
 0x369   : > { %v4105_v43 = vpop.permute.xlu1 %1749  ;;  %v4107_v55 = vpop.permute.xlu0 %1663 }
 0x36b   : > { %2071 = vrot.lane.b32.xlu1 %v1732_v60, %s2888_s6  ;;  %2020 = vrot.lane.b32.xlu0 %v1646_v48, %s2887_s26 }
 0x36d   : > { %v1953_v31 = vpop.permute.xlu1 %1952  ;;  %v1905_v58 = vpop.permute.xlu0 %1904 }
 0x36e   : > { %v2189_v50 = vsel %vm2188_vm0, %v2172_v49, %v1953_v31  ;;  %v2173_v3 = vsel %vm2171_vm15, %v2156_v10, %v1905_v58  ;;  %v2109_v58 = vsel %vm1085_vm6, %v3931_v23, %v4093_v30 }
 0x36f   : > { %1867 = vrot.lane.b32.xlu1 %v1646_v48, %s2881_s25  ;;  %1677 = vrot.lane.b32.xlu0 %v1644_v25, %s2874_s14  ;;  %v1737_v25 = vsel %vm567_vm2, %v1735_v36, %v1736_v11 }
 0x371   : > { %v4114_v0 = vpop.permute.xlu1 %1799  ;;  %v4116_v37 = vpop.permute.xlu0 %1751 }
 0x373   : > { %2073 = vrot.lane.b32.xlu1 %v1734_v39, %s2888_s6  ;;  %1918 = vrot.lane.b32.xlu0 %v1732_v60, %s2885_s27 }
 0x375   : > { %v2007_v13 = vpop.permute.xlu1 %2006  ;;  %v1955_v17 = vpop.permute.xlu0 %1954 }
 0x376   : > { %v2206_v62 = vsel %vm2205_vm1, %v2189_v50, %v2007_v13  ;;  %v2190_v5 = vsel %vm2188_vm0, %v2173_v3, %v1955_v17 }
 0x377   : > { %1765 = vrot.lane.b32.xlu1 %v1732_v60, %s2877_s17  ;;  %1679 = vrot.lane.b32.xlu0 %v1646_v48, %s2874_s14 }
 0x379   : > { %v4128_v12 = vpop.permute.xlu1 %1853  ;;  %v4130_v34 = vpop.permute.xlu0 %1801 }
 0x37b   : > { %1968 = vrot.lane.b32.xlu1 %v4125_v29, %s2886_s13  ;;  %1920 = vrot.lane.b32.xlu0 %v1734_v39, %s2885_s27 }
 0x37d   : > { %v2060_v7 = vpop.permute.xlu1 %2059  ;;  %v2009_v57 = vpop.permute.xlu0 %2008 }
 0x37e   : > { %v2223_v24 = vsel %vm2222_vm4, %v2206_v62, %v2060_v7  ;;  %v2207_v38 = vsel %vm2205_vm1, %v2190_v5, %v2009_v57 }
 0x37f   : > { %1815 = vrot.lane.b32.xlu1 %v4125_v29, %s2879_s29  ;;  %1767 = vrot.lane.b32.xlu0 %v1734_v39, %s2877_s17  ;;  %v2125_v39 = vsel %vm1127_vm8, %v2109_v58, %v4105_v43 }
 0x380   : > { %2729 = vmatprep.mubr.msk.f32.mxu1 %vm2245_vm5, %v2223_v24  ;;  %v2141_v13 = vsel %vm1169_vm10, %v2125_v39, %v4114_v0  ;;  %v1652_v0 = vrot.slane %v4197_v54, 1 }
 0x381   : > { %v4155_v61 = vpop.permute.xlu1 %1855  ;;  %v4157_v27 = vpop.permute.xlu0 %1665  ;;  %v2157_v23 = vsel %vm1211_vm12, %v2141_v13, %v4128_v12  ;;  %v2110_v12 = vsel %vm1085_vm6, %v3929_v19, %v4107_v55  ;;  %v1576_v19 = vld [vmem:[#allocation3 + $0xb8] sm:$0x3]  ;;  %v1578_v13 = vld [vmem:[#allocation3 + $0xc8] sm:$0xff] }
 0x382   : > { %v2126_v40 = vsel %vm1127_vm8, %v2110_v12, %v4116_v37  ;;  %v1654_v62 = vsel %vm456_vm3, %v1652_v0, %v1653_v4  ;;  %v1655_v22 = vrot.slane %v1576_v19, 1 }
 0x383   : > { %2022 = vrot.lane.b32.xlu1 %v1649_v8, %s2887_s26  ;;  %1970 = vrot.lane.b32.xlu0 %v4132_v44, %s2886_s13  ;;  %v2142_v7 = vsel %vm1169_vm10, %v2126_v40, %v4130_v34  ;;  %v1741_v34 = vrot.slane %v4205_v59, 2  ;;  %v1579_v40 = vld [vmem:[#allocation3 + $0xd0] sm:$0x3] }
 0x384   : > { %v2158_v55 = vsel %vm1211_vm12, %v2142_v7, %v4155_v61  ;;  %v1656_v36 = vsel %vm456_vm3, %v1653_v4, %v1655_v22  ;;  %v1898_v7 = vrot.slane %v1578_v13, 2 }
 0x385   : > { %v2062_v51 = vpop.permute.xlu1 %2061  ;;  %v1907_v18 = vpop.permute.xlu0 %1906 }
 0x386   : > { %v2224_v56 = vsel %vm2222_vm4, %v2207_v38, %v2062_v51  ;;  %v2174_v30 = vsel %vm2171_vm15, %v2157_v23, %v1907_v18  ;;  %v1743_v38 = vrot.slane %v1576_v19, 2  ;;  %v1847_v19 = vrot.slane %v1579_v40, 1 }
 0x387   : > { %1869 = vrot.lane.b32.xlu1 %v1649_v8, %s2881_s25  ;;  %1817 = vrot.lane.b32.xlu0 %v4132_v44, %s2879_s29 }
 0x388   : > { %2730 = vmatmul.mubr.msk.f32.vlgmr.msra.gmra.mrb[0].mxu1 %vm2245_vm5, %v2224_v56  ;;  %v1744_v56 = vsel %vm567_vm2, %v1741_v34, %v1743_v38  ;;  %v1582_v38 = vld [vmem:[#allocation3 + $0xe8] sm:$0x3] }
 0x389   : > { %v4175_v35 = vpop.permute.xlu1 %1753  ;;  %v4177_v26 = vpop.permute.xlu0 %1667 }
 0x38b   : > { %2075 = vrot.lane.b32.xlu1 %v1737_v25, %s2888_s6  ;;  %2024 = vrot.lane.b32.xlu0 %v1651_v53, %s2887_s26 }
 0x38d   : > { %v1957_v21 = vpop.permute.xlu1 %1956  ;;  %v1909_v6 = vpop.permute.xlu0 %1908 }
 0x38e   : > { %v2191_v43 = vsel %vm2188_vm0, %v2174_v30, %v1957_v21  ;;  %v2175_v9 = vsel %vm2171_vm15, %v2158_v55, %v1909_v6  ;;  %v2111_v6 = vsel %vm1085_vm6, %v3964_v15, %v4157_v27  ;;  %v1845_v30 = vrot.slane %v1578_v13, 1 }
 0x38f   : > { %1871 = vrot.lane.b32.xlu1 %v1651_v53, %s2881_s25  ;;  %1681 = vrot.lane.b32.xlu0 %v1649_v8, %s2874_s14  ;;  %v1740_v8 = vrot.slane %v4197_v54, 2 }
 0x391   : > { %v4184_v60 = vpop.permute.xlu1 %1803  ;;  %v4186_v48 = vpop.permute.xlu0 %1755  ;;  %v1742_v5 = vsel %vm567_vm2, %v1740_v8, %v1741_v34  ;;  %v1848_v8 = vsel %vm456_vm3, %v1845_v30, %v1847_v19 }
 0x393   : > { %2077 = vrot.lane.b32.xlu1 %v1739_v52, %s2888_s6  ;;  %1922 = vrot.lane.b32.xlu0 %v1737_v25, %s2885_s27 }
 0x395   : > { %v2011_v14 = vpop.permute.xlu1 %2010  ;;  %v1959_v31 = vpop.permute.xlu0 %1958 }
 0x396   : > { %v2208_v49 = vsel %vm2205_vm1, %v2191_v43, %v2011_v14  ;;  %v2192_v37 = vsel %vm2188_vm0, %v2175_v9, %v1959_v31  ;;  %v1577_v14 = vld [vmem:[#allocation3 + $0xc0] sm:$0xff] }
 0x397   : > { %1769 = vrot.lane.b32.xlu1 %v1737_v25, %s2877_s17  ;;  %1683 = vrot.lane.b32.xlu0 %v1651_v53, %s2874_s14 }
 0x399   : > { %v4201_v17 = vpop.permute.xlu1 %1857  ;;  %v4203_v45 = vpop.permute.xlu0 %1805 }
 0x39b   : > { %1972 = vrot.lane.b32.xlu1 %v4197_v54, %s2886_s13  ;;  %1924 = vrot.lane.b32.xlu0 %v1739_v52, %s2885_s27 }
 0x39d   : > { %v2064_v50 = vpop.permute.xlu1 %2063  ;;  %v2013_v46 = vpop.permute.xlu0 %2012 }
 0x39e   : > { %v2225_v2 = vsel %vm2222_vm4, %v2208_v49, %v2064_v50  ;;  %v2209_v20 = vsel %vm2205_vm1, %v2192_v37, %v2013_v46 }
 0x39f   : > { %1819 = vrot.lane.b32.xlu1 %v4197_v54, %s2879_s29  ;;  %1771 = vrot.lane.b32.xlu0 %v1739_v52, %s2877_s17  ;;  %v2127_v52 = vsel %vm1127_vm8, %v2111_v6, %v4175_v35  ;;  %v1844_v35 = vrot.slane %v1577_v14, 1 }
 0x3a0   : > { %2732 = vmatprep.mubr.msk.f32.mxu1 %vm2245_vm5, %v2225_v2  ;;  %v2143_v31 = vsel %vm1169_vm10, %v2127_v52, %v4184_v60 }
 0x3a1   : > { %v4230_v57 = vpop.permute.xlu1 %1859  ;;  %v4232_v24 = vpop.permute.xlu0 %1669  ;;  %v2159_v23 = vsel %vm1211_vm12, %v2143_v31, %v4201_v17  ;;  %v2112_v17 = vsel %vm1085_vm6, %v3967_v28, %v4177_v26  ;;  %v1846_v50 = vsel %vm456_vm3, %v1844_v35, %v1845_v30 }
 0x3a2   : > { %v2128_v49 = vsel %vm1127_vm8, %v2112_v17, %v4186_v48 }
 0x3a3   : > { %2026 = vrot.lane.b32.xlu1 %v1654_v62, %s2887_s26  ;;  %1974 = vrot.lane.b32.xlu0 %v4205_v59, %s2886_s13  ;;  %v2144_v46 = vsel %vm1169_vm10, %v2128_v49, %v4203_v45 }
 0x3a4   : > { %v2160_v28 = vsel %vm1211_vm12, %v2144_v46, %v4230_v57 }
 0x3a5   : > { %v2066_v10 = vpop.permute.xlu1 %2065  ;;  %v1911_v3 = vpop.permute.xlu0 %1910 }
 0x3a6   : > { %v2226_v61 = vsel %vm2222_vm4, %v2209_v20, %v2066_v10  ;;  %v2176_v15 = vsel %vm2171_vm15, %v2159_v23, %v1911_v3  ;;  %v1900_v20 = vrot.slane %v1579_v40, 2 }
 0x3a7   : > { %1873 = vrot.lane.b32.xlu1 %v1654_v62, %s2881_s25  ;;  %1821 = vrot.lane.b32.xlu0 %v4205_v59, %s2879_s29 }
 0x3a8   : > { %2733 = vmatmul.mubr.msk.f32.gmra.mrb[2].mxu1 %vm2245_vm5, %v2226_v61  ;;  %v1901_v61 = vsel %vm567_vm2, %v1898_v7, %v1900_v20 }
 0x3a9   : > { %v4251_v11 = vpop.permute.xlu1 %1757  ;;  %v4253_v41 = vpop.permute.xlu0 %1671 }
 0x3ab   : > { %2079 = vrot.lane.b32.xlu1 %v1742_v5, %s2888_s6  ;;  %2028 = vrot.lane.b32.xlu0 %v1656_v36, %s2887_s26 }
 0x3ad   : > { %v1961_v51 = vpop.permute.xlu1 %1960  ;;  %v1913_v18 = vpop.permute.xlu0 %1912 }
 0x3ae   : > { %v2193_v27 = vsel %vm2188_vm0, %v2176_v15, %v1961_v51  ;;  %v2177_v26 = vsel %vm2171_vm15, %v2160_v28, %v1913_v18 }
 0x3af   : > { %1875 = vrot.lane.b32.xlu1 %v1656_v36, %s2881_s25  ;;  %1685 = vrot.lane.b32.xlu0 %v1654_v62, %s2874_s14  ;;  %v1897_v62 = vrot.slane %v1577_v14, 2 }
 0x3b1   : > { %v4260_v25 = vpop.permute.xlu1 %1807  ;;  %v4262_v53 = vpop.permute.xlu0 %1759  ;;  %v1899_v57 = vsel %vm567_vm2, %v1897_v62, %v1898_v7 }
 0x3b3   : > { %2081 = vrot.lane.b32.xlu1 %v1744_v56, %s2888_s6  ;;  %1926 = vrot.lane.b32.xlu0 %v1742_v5, %s2885_s27 }
 0x3b5   : > { %v2015_v33 = vpop.permute.xlu1 %2014  ;;  %v1963_v21 = vpop.permute.xlu0 %1962 }
 0x3b6   : > { %v2210_v60 = vsel %vm2205_vm1, %v2193_v27, %v2015_v33  ;;  %v2194_v48 = vsel %vm2188_vm0, %v2177_v26, %v1963_v21  ;;  %v2004_v33 = vrot.slane %v1582_v38, 1  ;;  %v2057_v27 = vrot.slane %v1582_v38, 2 }
 0x3b7   : > { %1773 = vrot.lane.b32.xlu1 %v1742_v5, %s2877_s17  ;;  %1687 = vrot.lane.b32.xlu0 %v1656_v36, %s2874_s14  ;;  %v1581_v5 = vld [vmem:[#allocation3 + $0xe0] sm:$0xff]  ;;  %v1580_v36 = vld [vmem:[#allocation3 + $0xd8] sm:$0xff] }
 0x3b8   : > { %v2001_v21 = vrot.slane %v1580_v36, 1  ;;  %v2055_v15 = vrot.slane %v1581_v5, 2  ;;  %v2054_v35 = vrot.slane %v1580_v36, 2 }
 0x3b9   : > { %v4275_v58 = vpop.permute.xlu1 %1861  ;;  %v4277_v39 = vpop.permute.xlu0 %1809 }
 0x3bb   : > { %1976 = vrot.lane.b32.xlu1 %v1577_v14, %s2886_s13  ;;  %1928 = vrot.lane.b32.xlu0 %v1744_v56, %s2885_s27 }
 0x3bd   : > { %v2068_v43 = vpop.permute.xlu1 %2067  ;;  %v2017_v0 = vpop.permute.xlu0 %2016 }
 0x3be   : > { %v2227_v4 = vsel %vm2222_vm4, %v2210_v60, %v2068_v43  ;;  %v2211_v45 = vsel %vm2205_vm1, %v2194_v48, %v2017_v0 }
 0x3bf   : > { %1823 = vrot.lane.b32.xlu1 %v1577_v14, %s2879_s29  ;;  %1775 = vrot.lane.b32.xlu0 %v1744_v56, %s2877_s17  ;;  %v2002_v56 = vrot.slane %v1581_v5, 1  ;;  %v2113_v14 = vsel %vm1085_vm6, %v4012_v47, %v4232_v24 }
 0x3c0   : > { %2735 = vmatprep.mubr.msk.f32.mxu1 %vm2245_vm5, %v2227_v4  ;;  %v2129_v23 = vsel %vm1127_vm8, %v2113_v14, %v4251_v11  ;;  %v2058_v11 = vsel %vm567_vm2, %v2055_v15, %v2057_v27  ;;  %v2056_v4 = vsel %vm567_vm2, %v2054_v35, %v2055_v15 }
 0x3c1   : > { %v4298_v2 = vpop.permute.xlu1 %1863  ;;  %v4300_v12 = vpop.permute.xlu0 %1673  ;;  %v2005_v31 = vsel %vm456_vm3, %v2002_v56, %v2004_v33  ;;  %v2145_v30 = vsel %vm1169_vm10, %v2129_v23, %v4260_v25 }
 0x3c2   : > { %v2161_v47 = vsel %vm1211_vm12, %v2145_v30, %v4275_v58  ;;  %v2114_v58 = vsel %vm1085_vm6, %v4014_v16, %v4253_v41  ;;  %v2115_v20 = vsel %vm1085_vm6, %v4044_v1, %v4300_v12 }
 0x3c3   : > { %2030 = vrot.lane.b32.xlu1 %v1846_v50, %s2887_s26  ;;  %1978 = vrot.lane.b32.xlu0 %v1578_v13, %s2886_s13  ;;  %v2130_v46 = vsel %vm1127_vm8, %v2114_v58, %v4262_v53 }
 0x3c4   : > { %v2146_v40 = vsel %vm1169_vm10, %v2130_v46, %v4277_v39 }
 0x3c5   : > { %v2070_v55 = vpop.permute.xlu1 %2069  ;;  %v1915_v9 = vpop.permute.xlu0 %1914  ;;  %v2162_v48 = vsel %vm1211_vm12, %v2146_v40, %v4298_v2 }
 0x3c6   : > { %v2228_v37 = vsel %vm2222_vm4, %v2211_v45, %v2070_v55  ;;  %v2178_v24 = vsel %vm2171_vm15, %v2161_v47, %v1915_v9 }
 0x3c7   : > { %1877 = vrot.lane.b32.xlu1 %v1846_v50, %s2881_s25  ;;  %1825 = vrot.lane.b32.xlu0 %v1578_v13, %s2879_s29  ;;  %v2003_v13 = vsel %vm456_vm3, %v2001_v21, %v2002_v56 }
 0x3c8   : > { %2736 = vmatmul.mubr.msk.f32.gmra.mrb[4].mxu1 %vm2245_vm5, %v2228_v37 }
 0x3c9   : > { %v4315_v34 = vpop.permute.xlu1 %1761  ;;  %v4317_v22 = vpop.permute.xlu0 %1675 }
 0x3ca   : > { %v2116_v1 = vsel %vm1085_vm6, %v4046_v63, %v4317_v22 }
 0x3cb   : > { %2083 = vrot.lane.b32.xlu1 %v1899_v57, %s2888_s6  ;;  %2032 = vrot.lane.b32.xlu0 %v1848_v8, %s2887_s26 }
 0x3cd   : > { %v1965_v10 = vpop.permute.xlu1 %1964  ;;  %v1917_v3 = vpop.permute.xlu0 %1916 }
 0x3ce   : > { %v2195_v0 = vsel %vm2188_vm0, %v2178_v24, %v1965_v10  ;;  %v2179_v62 = vsel %vm2171_vm15, %v2162_v48, %v1917_v3  ;;  %v2131_v10 = vsel %vm1127_vm8, %v2115_v20, %v4315_v34 }
 0x3cf   : > { %1930 = vrot.lane.b32.xlu1 %v1899_v57, %s2885_s27  ;;  %1879 = vrot.lane.b32.xlu0 %v1848_v8, %s2881_s25 }
 0x3d1   : > { %v1812_v51 = vpop.permute.xlu1 %1811  ;;  %v4324_v18 = vpop.permute.xlu0 %1763 }
 0x3d2   : > { %v2147_v3 = vsel %vm1169_vm10, %v2131_v10, %v1812_v51  ;;  %v2132_v12 = vsel %vm1127_vm8, %v2116_v1, %v4324_v18 }
 0x3d3   : > { %1932 = vrot.lane.b32.xlu1 %v1901_v61, %s2885_s27  ;;  %2085 = vrot.lane.b32.xlu0 %v1901_v61, %s2888_s6 }
 0x3d5   : > { %v2019_v6 = vpop.permute.xlu1 %2018  ;;  %v1967_v52 = vpop.permute.xlu0 %1966 }
 0x3d6   : > { %v2212_v17 = vsel %vm2205_vm1, %v2195_v0, %v2019_v6  ;;  %v2196_v16 = vsel %vm2188_vm0, %v2179_v62, %v1967_v52 }
 0x3d7   : > { %1982 = vrot.lane.b32.xlu1 %v1581_v5, %s2886_s13  ;;  %1980 = vrot.lane.b32.xlu0 %v1580_v36, %s2886_s13 }
 0x3d9   : > { %v1866_v60 = vpop.permute.xlu1 %1865  ;;  %v1814_v43 = vpop.permute.xlu0 %1813 }
 0x3da   : > { %v2163_v36 = vsel %vm1211_vm12, %v2147_v3, %v1866_v60  ;;  %v2148_v34 = vsel %vm1169_vm10, %v2132_v12, %v1814_v43 }
 0x3db   : > { %2036 = vrot.lane.b32.xlu1 %v2005_v31, %s2887_s26  ;;  %2034 = vrot.lane.b32.xlu0 %v2003_v13, %s2887_s26 }
 0x3dd   : > { %v2072_v25 = vpop.permute.xlu1 %2071  ;;  %v2021_v49 = vpop.permute.xlu0 %2020 }
 0x3de   : > { %v2229_v50 = vsel %vm2222_vm4, %v2212_v17, %v2072_v25  ;;  %v2213_v41 = vsel %vm2205_vm1, %v2196_v16, %v2021_v49 }
 0x3df   : > { %2089 = vrot.lane.b32.xlu1 %v2058_v11, %s2888_s6  ;;  %2087 = vrot.lane.b32.xlu0 %v2056_v4, %s2888_s6 }
 0x3e0   : > { %2738 = vmatprep.mubr.msk.f32.mxu1 %vm2245_vm5, %v2229_v50 }
 0x3e1   : > { %v1868_v28 = vpop.permute.xlu1 %1867  ;;  %v1678_v26 = vpop.permute.xlu0 %1677 }
 0x3e2   : > { %v2164_v31 = vsel %vm1211_vm12, %v2148_v34, %v1868_v28  ;;  %v2117_v11 = vsel %vm1085_vm6, %v4076_v32, %v1678_v26 }
 0x3e5   : > { %v2074_v7 = vpop.permute.xlu1 %2073  ;;  %v1919_v19 = vpop.permute.xlu0 %1918 }
 0x3e6   : > { %v2230_v53 = vsel %vm2222_vm4, %v2213_v41, %v2074_v7  ;;  %v2180_v38 = vsel %vm2171_vm15, %v2163_v36, %v1919_v19 }
 0x3e7   : > { %2739 = vmatmul.mubr.msk.f32.gmra.mrb[6].mxu1 %vm2245_vm5, %v2230_v53 }
 0x3e9   : > { %v1766_v45 = vpop.permute.xlu1 %1765  ;;  %v1680_v55 = vpop.permute.xlu0 %1679 }
 0x3ea   : > { %v2133_v4 = vsel %vm1127_vm8, %v2117_v11, %v1766_v45  ;;  %v2118_v32 = vsel %vm1085_vm6, %v4080_v42, %v1680_v55 }
 0x3ed   : > { %v1969_v39 = vpop.permute.xlu1 %1968  ;;  %v1921_v9 = vpop.permute.xlu0 %1920 }
 0x3ee   : > { %v2197_v56 = vsel %vm2188_vm0, %v2180_v38, %v1969_v39  ;;  %v2181_v13 = vsel %vm2171_vm15, %v2164_v31, %v1921_v9 }
 0x3f1   : > { %v1816_v37 = vpop.permute.xlu1 %1815  ;;  %v1768_v57 = vpop.permute.xlu0 %1767 }
 0x3f2   : > { %v2149_v17 = vsel %vm1169_vm10, %v2133_v4, %v1816_v37  ;;  %v2134_v26 = vsel %vm1127_vm8, %v2118_v32, %v1768_v57 }
 0x3f5   : > { %v2023_v8 = vpop.permute.xlu1 %2022  ;;  %v1971_v2 = vpop.permute.xlu0 %1970 }
 0x3f6   : > { %v2214_v33 = vsel %vm2205_vm1, %v2197_v56, %v2023_v8  ;;  %v2198_v23 = vsel %vm2188_vm0, %v2181_v13, %v1971_v2 }
 0x3f9   : > { %v1870_v61 = vpop.permute.xlu1 %1869  ;;  %v1818_v5 = vpop.permute.xlu0 %1817 }
 0x3fa   : > { %v2165_v50 = vsel %vm1211_vm12, %v2149_v17, %v1870_v61  ;;  %v2150_v16 = vsel %vm1169_vm10, %v2134_v26, %v1818_v5 }
 0x3fd   : > { %v2076_v21 = vpop.permute.xlu1 %2075  ;;  %v2025_v6 = vpop.permute.xlu0 %2024 }
 0x3fe   : > { %v2231_v52 = vsel %vm2222_vm4, %v2214_v33, %v2076_v21  ;;  %v2215_v15 = vsel %vm2205_vm1, %v2198_v23, %v2025_v6 }
 0x3ff   : > { %2741 = vmatprep.mubr.msk.f32.mxu1 %vm2245_vm5, %v2231_v52 }
 0x401   : > { %v1872_v51 = vpop.permute.xlu1 %1871  ;;  %v1682_v14 = vpop.permute.xlu0 %1681 }
 0x402   : > { %v2166_v19 = vsel %vm1211_vm12, %v2150_v16, %v1872_v51  ;;  %v2119_v5 = vsel %vm1085_vm6, %v4125_v29, %v1682_v14  ;;  %v2601_v16 = vld [vmem:[%s4504_s4] ss:$0 sm:$0xff] }
 0x405   : > { %v2078_v27 = vpop.permute.xlu1 %2077  ;;  %v1923_v35 = vpop.permute.xlu0 %1922 }
 0x406   : > { %v2232_v63 = vsel %vm2222_vm4, %v2215_v15, %v2078_v27  ;;  %v2182_v58 = vsel %vm2171_vm15, %v2165_v50, %v1923_v35 }
 0x407   : > { %2742 = vmatmul.mubr.msk.f32.gmra.mrb[8].mxu1 %vm2245_vm5, %v2232_v63 }
 0x409   : > { %v1770_v22 = vpop.permute.xlu1 %1769  ;;  %v1684_v18 = vpop.permute.xlu0 %1683 }
 0x40a   : > { %v2135_v36 = vsel %vm1127_vm8, %v2119_v5, %v1770_v22  ;;  %v2120_v29 = vsel %vm1085_vm6, %v4132_v44, %v1684_v18 }
 0x40d   : > { %v1973_v30 = vpop.permute.xlu1 %1972  ;;  %v1925_v60 = vpop.permute.xlu0 %1924 }
 0x40e   : > { %v2199_v46 = vsel %vm2188_vm0, %v2182_v58, %v1973_v30  ;;  %v2183_v53 = vsel %vm2171_vm15, %v2166_v19, %v1925_v60 }
 0x411   : > { %v1820_v43 = vpop.permute.xlu1 %1819  ;;  %v1772_v47 = vpop.permute.xlu0 %1771 }
 0x412   : > { %v2151_v38 = vsel %vm1169_vm10, %v2135_v36, %v1820_v43  ;;  %v2136_v14 = vsel %vm1127_vm8, %v2120_v29, %v1772_v47 }
 0x415   : > { %v2027_v24 = vpop.permute.xlu1 %2026  ;;  %v1975_v0 = vpop.permute.xlu0 %1974 }
 0x416   : > { %v2216_v40 = vsel %vm2205_vm1, %v2199_v46, %v2027_v24  ;;  %v2200_v45 = vsel %vm2188_vm0, %v2183_v53, %v1975_v0 }
 0x419   : > { %v1874_v25 = vpop.permute.xlu1 %1873  ;;  %v1822_v49 = vpop.permute.xlu0 %1821 }
 0x41a   : > { %v2167_v21 = vsel %vm1211_vm12, %v2151_v38, %v1874_v25  ;;  %v2152_v31 = vsel %vm1169_vm10, %v2136_v14, %v1822_v49 }
 0x41d   : > { %v2080_v28 = vpop.permute.xlu1 %2079  ;;  %v2029_v48 = vpop.permute.xlu0 %2028 }
 0x41e   : > { %v2233_v62 = vsel %vm2222_vm4, %v2216_v40, %v2080_v28  ;;  %v2217_v39 = vsel %vm2205_vm1, %v2200_v45, %v2029_v48 }
 0x41f   : > { %2744 = vmatprep.mubr.msk.f32.mxu1 %vm2245_vm5, %v2233_v62 }
 0x421   : > { %v1876_v41 = vpop.permute.xlu1 %1875  ;;  %v1686_v7 = vpop.permute.xlu0 %1685 }
 0x422   : > { %v2168_v15 = vsel %vm1211_vm12, %v2152_v31, %v1876_v41  ;;  %v2121_v43 = vsel %vm1085_vm6, %v4197_v54, %v1686_v7 }
 0x425   : > { %v2082_v9 = vpop.permute.xlu1 %2081  ;;  %v1927_v37 = vpop.permute.xlu0 %1926 }
 0x426   : > { %v2234_v42 = vsel %vm2222_vm4, %v2217_v39, %v2082_v9  ;;  %v2184_v6 = vsel %vm2171_vm15, %v2167_v21, %v1927_v37 }
 0x427   : > { %2745 = vmatmul.mubr.msk.f32.gmra.mrb[10].mxu1 %vm2245_vm5, %v2234_v42 }
 0x429   : > { %v1774_v55 = vpop.permute.xlu1 %1773  ;;  %v1688_v57 = vpop.permute.xlu0 %1687 }
 0x42a   : > { %v2122_v47 = vsel %vm1085_vm6, %v4205_v59, %v1688_v57  ;;  %v2137_v24 = vsel %vm1127_vm8, %v2121_v43, %v1774_v55 }
 0x42d   : > { %v1977_v8 = vpop.permute.xlu1 %1976  ;;  %v1929_v2 = vpop.permute.xlu0 %1928 }
 0x42e   : > { %v2201_v52 = vsel %vm2188_vm0, %v2184_v6, %v1977_v8  ;;  %v2185_v27 = vsel %vm2171_vm15, %v2168_v15, %v1929_v2 }
 0x431   : > { %v1824_v20 = vpop.permute.xlu1 %1823  ;;  %v1776_v10 = vpop.permute.xlu0 %1775 }
 0x432   : > { %v2138_v0 = vsel %vm1127_vm8, %v2122_v47, %v1776_v10  ;;  %v2153_v11 = vsel %vm1169_vm10, %v2137_v24, %v1824_v20 }
 0x435   : > { %v2031_v3 = vpop.permute.xlu1 %2030  ;;  %v1979_v61 = vpop.permute.xlu0 %1978 }
 0x436   : > { %v2218_v1 = vsel %vm2205_vm1, %v2201_v52, %v2031_v3  ;;  %v2202_v35 = vsel %vm2188_vm0, %v2185_v27, %v1979_v61 }
 0x439   : > { %v1878_v56 = vpop.permute.xlu1 %1877  ;;  %v1826_v33 = vpop.permute.xlu0 %1825 }
 0x43a   : > { %v2154_v4 = vsel %vm1169_vm10, %v2138_v0, %v1826_v33  ;;  %v2169_v49 = vsel %vm1211_vm12, %v2153_v11, %v1878_v56 }
 0x43d   : > { %v2084_v12 = vpop.permute.xlu1 %2083  ;;  %v2033_v34 = vpop.permute.xlu0 %2032 }
 0x43e   : > { %v2235_v51 = vsel %vm2222_vm4, %v2218_v1, %v2084_v12  ;;  %v2219_v63 = vsel %vm2205_vm1, %v2202_v35, %v2033_v34 }
 0x43f   : > { %2747 = vmatprep.mubr.msk.f32.mxu1 %vm2245_vm5, %v2235_v51 }
 0x441   : > { %v1931_v13 = vpop.permute.xlu1 %1930  ;;  %v1880_v23 = vpop.permute.xlu0 %1879 }
 0x442   : > { %v2170_v50 = vsel %vm1211_vm12, %v2154_v4, %v1880_v23  ;;  %v2186_v58 = vsel %vm2171_vm15, %v2169_v49, %v1931_v13 }
 0x445   : > { %v1933_v22 = vpop.permute.xlu1 %1932  ;;  %v2086_v30 = vpop.permute.xlu0 %2085 }
 0x446   : > { %v2236_v44 = vsel %vm2222_vm4, %v2219_v63, %v2086_v30  ;;  %v2187_v54 = vsel %vm2171_vm15, %v2170_v50, %v1933_v22 }
 0x447   : > { %2748 = vmatmul.mubr.msk.f32.gmra.mrb[12].mxu1 %vm2245_vm5, %v2236_v44 }
 0x449   : > { %v1983_v18 = vpop.permute.xlu1 %1982  ;;  %v1981_v60 = vpop.permute.xlu0 %1980 }
 0x44a   : > { %v2204_v59 = vsel %vm2188_vm0, %v2187_v54, %v1983_v18  ;;  %v2203_v46 = vsel %vm2188_vm0, %v2186_v58, %v1981_v60 }
 0x44d   : > { %v2037_v17 = vpop.permute.xlu1 %2036  ;;  %v2035_v25 = vpop.permute.xlu0 %2034 }
 0x44e   : > { %v2221_v40 = vsel %vm2205_vm1, %v2204_v59, %v2037_v17  ;;  %v2220_v28 = vsel %vm2205_vm1, %v2203_v46, %v2035_v25 }
 0x451   : > { %v2090_v48 = vpop.permute.xlu1 %2089  ;;  %v2088_v62 = vpop.permute.xlu0 %2087 }
 0x452   : > { %v2238_v32 = vsel %vm2222_vm4, %v2221_v40, %v2090_v48  ;;  %v2237_v26 = vsel %vm2222_vm4, %v2220_v28, %v2088_v62 }
 0x453   : > { %2750 = vmatprep.mubr.msk.f32.mxu1 %vm2245_vm5, %v2237_v26 }
 0x454   : > { %2751 = vmatmul.mubr.msk.f32.gmra.mrb[14].mxu1 %vm2245_vm5, %v2238_v32 }
 0x45b   : > { %v2731_v41 = vpop.f32.mrb[0].mxu1 }
 0x45c   : > { %v2366_v7 = vadd.f32 %v2731_v41, %v2601_v16  ;;  %v2360_v19 = vpop.f32.mrb[1].mxu1 }
 0x45d   : > { %v2361_v53 = vadd.f32 %v2601_v16, %v2360_v19 }
 0x45e   : > { %v2440_v45 = vmax.f32 %v2366_v7, 0.0 }
 0x45f   : > { %v2439_v39 = vmax.f32 %v2361_v53, 0.0 }
 0x460   : > { %2456 = vst.msk [vmem:[%s2960_s11 + $0x8] sm:$0xff] %vm1085_vm6, %v2440_v45 }
 0x461   : > { %2455 = vst.msk [vmem:[%s2960_s11] sm:$0xff] %vm1085_vm6, %v2439_v39 }
 0x47b   : > { %v2734_v9 = vpop.f32.mrb[2].mxu1 }
 0x47c   : > { %v2376_v37 = vadd.f32 %v2734_v9, %v2601_v16  ;;  %v2370_v42 = vpop.f32.mrb[3].mxu1 }
 0x47d   : > { %v2371_v55 = vadd.f32 %v2601_v16, %v2370_v42 }
 0x47e   : > { %v2442_v57 = vmax.f32 %v2376_v37, 0.0 }
 0x47f   : > { %v2441_v8 = vmax.f32 %v2371_v55, 0.0 }
 0x480   : > { %2458 = vst.msk [vmem:[%s2960_s11 + $0x18] sm:$0xff] %vm1085_vm6, %v2442_v57 }
 0x481   : > { %2457 = vst.msk [vmem:[%s2960_s11 + $0x10] sm:$0xff] %vm1085_vm6, %v2441_v8 }
 0x49b   : > { %v2737_v2 = vpop.f32.mrb[4].mxu1 }
 0x49c   : > { %v2386_v20 = vadd.f32 %v2737_v2, %v2601_v16  ;;  %v2380_v10 = vpop.f32.mrb[5].mxu1 }
 0x49d   : > { %v2381_v3 = vadd.f32 %v2601_v16, %v2380_v10 }
 0x49e   : > { %v2444_v61 = vmax.f32 %v2386_v20, 0.0 }
 0x49f   : > { %v2443_v5 = vmax.f32 %v2381_v3, 0.0 }
 0x4a0   : > { %2460 = vst.msk [vmem:[%s2960_s11 + $0x28] sm:$0xff] %vm1085_vm6, %v2444_v61 }
 0x4a1   : > { %2459 = vst.msk [vmem:[%s2960_s11 + $0x20] sm:$0xff] %vm1085_vm6, %v2443_v5 }
 0x4ba   : > { %v2740_v36 = vpop.f32.mrb[6].mxu1 }
 0x4bb   : > { %v2396_v38 = vadd.f32 %v2740_v36, %v2601_v16  ;;  %v2390_v56 = vpop.f32.mrb[7].mxu1 }
 0x4bc   : > { %v2391_v33 = vadd.f32 %v2601_v16, %v2390_v56 }
 0x4bd   : > { %v2446_v21 = vmax.f32 %v2396_v38, 0.0 }
 0x4be   : > { %v2445_v6 = vmax.f32 %v2391_v33, 0.0 }
 0x4bf   : > { %2462 = vst.msk [vmem:[%s2960_s11 + $0x38] sm:$0xff] %vm1085_vm6, %v2446_v21 }
 0x4c0   : > { %2461 = vst.msk [vmem:[%s2960_s11 + $0x30] sm:$0xff] %vm1085_vm6, %v2445_v6 }
 0x4da   : > { %v2743_v52 = vpop.f32.mrb[8].mxu1 }
 0x4db   : > { %v2406_v1 = vadd.f32 %v2743_v52, %v2601_v16  ;;  %v2400_v12 = vpop.f32.mrb[9].mxu1 }
 0x4dc   : > { %v2401_v34 = vadd.f32 %v2601_v16, %v2400_v12 }
 0x4dd   : > { %v2448_v51 = vmax.f32 %v2406_v1, 0.0 }
 0x4de   : > { %v2447_v29 = vmax.f32 %v2401_v34, 0.0 }
 0x4df   : > { %2464 = vst.msk [vmem:[%s2960_s11 + $0x48] sm:$0xff] %vm1085_vm6, %v2448_v51 }
 0x4e0   : > { %2463 = vst.msk [vmem:[%s2960_s11 + $0x40] sm:$0xff] %vm1085_vm6, %v2447_v29 }
 0x4fa   : > { %v2746_v14 = vpop.f32.mrb[10].mxu1 }
 0x4fb   : > { %v2416_v31 = vadd.f32 %v2746_v14, %v2601_v16  ;;  %v2410_v13 = vpop.f32.mrb[11].mxu1 }
 0x4fc   : > { %v2411_v23 = vadd.f32 %v2601_v16, %v2410_v13 }
 0x4fd   : > { %v2450_v15 = vmax.f32 %v2416_v31, 0.0 }
 0x4fe   : > { %v2449_v27 = vmax.f32 %v2411_v23, 0.0 }
 0x4ff   : > { %2466 = vst.msk [vmem:[%s2960_s11 + $0x58] sm:$0xff] %vm1085_vm6, %v2450_v15 }
 0x500   : > { %2465 = vst.msk [vmem:[%s2960_s11 + $0x50] sm:$0xff] %vm1085_vm6, %v2449_v27 }
 0x51a   : > { %v2749_v35 = vpop.f32.mrb[12].mxu1 }
 0x51b   : > { %v2426_v63 = vadd.f32 %v2749_v35, %v2601_v16  ;;  %v2420_v22 = vpop.f32.mrb[13].mxu1 }
 0x51c   : > { %v2421_v30 = vadd.f32 %v2601_v16, %v2420_v22 }
 0x51d   : > { %v2452_v44 = vmax.f32 %v2426_v63, 0.0 }
 0x51e   : > { %v2451_v18 = vmax.f32 %v2421_v30, 0.0 }
 0x51f   : > { %2468 = vst.msk [vmem:[%s2960_s11 + $0x68] sm:$0xff] %vm1085_vm6, %v2452_v44 }
 0x520   : > { %2467 = vst.msk [vmem:[%s2960_s11 + $0x60] sm:$0xff] %vm1085_vm6, %v2451_v18 }
 0x527   : > { %v2752_v60 = vpop.f32.mrb[14].mxu1 }
 0x528   : > { %v2436_v43 = vadd.f32 %v2752_v60, %v2601_v16  ;;  %v2430_v47 = vpop.f32.mrb[15].mxu1 }
 0x529   : > { %v2431_v24 = vadd.f32 %v2601_v16, %v2430_v47 }
 0x52a   : > { %v2454_v0 = vmax.f32 %v2436_v43, 0.0 }
 0x52b   : > { %v2453_v11 = vmax.f32 %v2431_v24, 0.0 }
 0x52c   : > { %2470 = vst.msk [vmem:[%s2960_s11 + $0x78] sm:$0xff] %vm1085_vm6, %v2454_v0 }
 0x52d   : > { %2469 = vst.msk [vmem:[%s2960_s11 + $0x70] sm:$0xff] %vm1085_vm6, %v2453_v11 }
 0x52e PF: > { %s15_s22 = sadd.s32 1, %s2871_s22   ;;  %s4506_s18 = smov %s2863_s20 }
 0x52f   : > { %p12_p9 = scmp.ge.s32.totalorder %s15_s22, 6   ;;  %s4507_s19 = smov %s2867_s21 }
 0x530   : > { %s4508_s20 = smov %s4511_s23  ;;  %s4509_s21 = smov %s4515_s24 }
 0x531   :  { %14 = sbr.rel (!%p12_p9) target bundleno = 3 (0x3), region = 85 }

</bundles_post_ra>
